<compile_context>
chip_gen: v7x
topology: tpu7x:2x2x1
jax: 0.10.0
libtpu: 0.0.40
codegen_flags: <defaults>
</compile_context>

<pallas_src>
import jax
import jax.numpy as jnp
from jax.experimental import pallas as pl
from jax.experimental.pallas import tpu as pltpu

# ---------------- config ----------------
BATCH = 2
CHANNELS = 3
IMG = 32
PATCH = 16
HIDDEN = 32
NUM_HEADS = 2
HEAD_DIM = HIDDEN // NUM_HEADS
MLP_DIM = 64
NUM_LAYERS = 2
LN_EPS = 1e-5

NUM_PATCHES = (IMG // PATCH) * (IMG // PATCH)
SEQ = NUM_PATCHES + 1          # 5 real tokens (CLS + 4 patches)
SEQ_PAD = 8                    # padded to a sublane multiple
PATCH_FEAT = CHANNELS * PATCH * PATCH
QKV_PAD = 128                  # 3*HIDDEN = 96 -> lane-dense 128
MLP_PAD = 128                  # MLP_DIM = 64 -> lane-dense 128
ATTN_SCALE = HEAD_DIM ** -0.5


# ---------------- in-kernel helpers ----------------
def _ln(x, g, b):
    mu = jnp.mean(x, axis=-1, keepdims=True)
    var = jnp.mean(jnp.square(x - mu), axis=-1, keepdims=True)
    return (x - mu) * jax.lax.rsqrt(var + LN_EPS) * g + b


# ---------------- fused forward kernel (one batch element per grid step) ----
def _clip_fwd_kernel(
    patches_ref, patch_w_ref, emb_bias_ref,
    pre_g_ref, pre_b_ref,
    ln1_g_ref, ln1_b_ref, qkv_w_ref, qkv_b_ref, o_w_ref, o_b_ref,
    ln2_g_ref, ln2_b_ref, fc1_w_ref, fc1_b_ref, fc2_w_ref, fc2_b_ref,
    post_g_ref, post_b_ref,
    out_ref,
):
    f32 = jnp.float32
    bf16 = jnp.bfloat16

    # ---- embeddings: one matmul + precomputed bias (slab built in wrapper) ----
    x = jnp.dot(
        patches_ref[0], patch_w_ref[...], preferred_element_type=f32
    ) + emb_bias_ref[...]                                   # (SEQ_PAD, H)

    # ---- pre layernorm ----
    x = _ln(x, pre_g_ref[...], pre_b_ref[...])

    # key-padding mask (pad tokens must never be attended to)
    col = jax.lax.broadcasted_iota(jnp.int32, (SEQ_PAD, SEQ_PAD), 1)
    kmask = col < SEQ

    # ---- encoder layers (static unroll, all VMEM/vreg-resident) ----
    for l in range(NUM_LAYERS):
        # --- self-attention block ---
        res = x
        y = _ln(x, ln1_g_ref[l], ln1_b_ref[l]).astype(bf16)
        qkv = jnp.dot(
            y, qkv_w_ref[l], preferred_element_type=f32
        ) + qkv_b_ref[l]                                    # (SEQ_PAD, 128)
        qkv = qkv.astype(bf16)

        heads = []
        for h in range(NUM_HEADS):
            hs = h * HEAD_DIM
            q = qkv[:, 0 * HIDDEN + hs:0 * HIDDEN + hs + HEAD_DIM]
            k = qkv[:, 1 * HIDDEN + hs:1 * HIDDEN + hs + HEAD_DIM]
            v = qkv[:, 2 * HIDDEN + hs:2 * HIDDEN + hs + HEAD_DIM]
            s = jax.lax.dot_general(
                q, k, (((1,), (1,)), ((), ())), preferred_element_type=f32
            ) * ATTN_SCALE                                  # (SEQ_PAD, SEQ_PAD)
            s = jnp.where(kmask, s, -1e30)
            s = s - jnp.max(s, axis=-1, keepdims=True)
            p = jnp.exp(s)
            p = p * pl.reciprocal(
                jnp.sum(p, axis=-1, keepdims=True), approx=True
            )
            heads.append(
                jnp.dot(p.astype(bf16), v, preferred_element_type=f32)
            )                                               # (SEQ_PAD, HEAD_DIM)
        attn = jnp.concatenate(heads, axis=-1).astype(bf16)  # (SEQ_PAD, H)
        attn = jnp.dot(
            attn, o_w_ref[l], preferred_element_type=f32
        ) + o_b_ref[l]
        x = res + attn

        # --- MLP block (fc1 + quick_gelu + fc2, lane-padded to 128) ---
        res = x
        y = _ln(x, ln2_g_ref[l], ln2_b_ref[l]).astype(bf16)
        hid = jnp.dot(
            y, fc1_w_ref[l], preferred_element_type=f32
        ) + fc1_b_ref[l]                                    # (SEQ_PAD, 128)
        hid = hid * jax.nn.sigmoid(1.702 * hid)             # quick_gelu
        y2 = jnp.dot(
            hid.astype(bf16), fc2_w_ref[l], preferred_element_type=f32
        ) + fc2_b_ref[l]
        x = res + y2

    # ---- post_layernorm on the full slab; wrapper slices the CLS row ----
    out_ref[0] = _ln(x, post_g_ref[...], post_b_ref[...])


# ---------------- wrapper ----------------
def _bcast_spec(shape):
    nd = len(shape)
    return pl.BlockSpec(shape, lambda b, _nd=nd: (0,) * _nd)


def clip_forward(params, pixel_values):
    """CLIP.forward: returns vision_model(image).pooler_output, shape (B, HIDDEN)."""
    B, C, H, W = pixel_values.shape
    p = PATCH
    hp, wp = H // p, W // p
    n_patches = hp * wp

    # layout plumbing in plain JAX (free, fused by XLA):
    # NCHW -> patch-major (B, NP, C*p*p), then zero-padded to (B, SEQ_PAD, C*p*p)
    # with zero rows at the CLS slot (row 0) and the pad slots (rows SEQ..SEQ_PAD-1).
    patches = (
        pixel_values.reshape(B, C, hp, p, wp, p)
        .transpose(0, 2, 4, 1, 3, 5)
        .reshape(B, n_patches, C * p * p)
    )
    patches_pad = jnp.zeros((B, SEQ_PAD, C * p * p), jnp.float32)
    patches_pad = patches_pad.at[:, 1:1 + n_patches, :].set(patches)
    patches_pad = patches_pad.astype(jnp.bfloat16)

    # TODO(synk): bicubic position-embedding interpolation (variable-resolution
    # input, npatch != N branch) not implemented; only the npatch == N path runs.
    pos = params["pos_emb"]                                 # (SEQ, H)
    emb_bias = jnp.zeros((SEQ_PAD, HIDDEN), jnp.float32)
    emb_bias = emb_bias.at[0].set(params["class_emb"] + pos[0])
    emb_bias = emb_bias.at[1:SEQ].set(pos[1:])

    layers = params["layers"]

    def pad_cols(w, total):
        return jnp.pad(w, ((0, 0), (0, total - w.shape[1])))

    qkv_w = jnp.stack([
        pad_cols(jnp.concatenate([l["q_w"], l["k_w"], l["v_w"]], axis=1), QKV_PAD)
        for l in layers
    ]).astype(jnp.bfloat16)                                  # (L, H, 128)
    qkv_b = jnp.stack([
        jnp.pad(jnp.concatenate([l["q_b"], l["k_b"], l["v_b"]]),
                (0, QKV_PAD - 3 * HIDDEN))[None, :]
        for l in layers
    ])                                                       # (L, 1, 128) f32
    ln1_g = jnp.stack([l["ln1_g"][None, :] for l in layers])
    ln1_b = jnp.stack([l["ln1_b"][None, :] for l in layers])
    o_w = jnp.stack([l["o_w"] for l in layers]).astype(jnp.bfloat16)
    o_b = jnp.stack([l["o_b"][None, :] for l in layers])
    ln2_g = jnp.stack([l["ln2_g"][None, :] for l in layers])
    ln2_b = jnp.stack([l["ln2_b"][None, :] for l in layers])
    fc1_w = jnp.stack(
        [pad_cols(l["fc1_w"], MLP_PAD) for l in layers]
    ).astype(jnp.bfloat16)                                   # (L, H, 128)
    fc1_b = jnp.stack(
        [jnp.pad(l["fc1_b"], (0, MLP_PAD - MLP_DIM))[None, :] for l in layers]
    )
    fc2_w = jnp.stack(
        [jnp.pad(l["fc2_w"], ((0, MLP_PAD - MLP_DIM), (0, 0))) for l in layers]
    ).astype(jnp.bfloat16)                                   # (L, 128, H)
    fc2_b = jnp.stack([l["fc2_b"][None, :] for l in layers])

    pre_g = params["pre_ln_g"][None, :]
    pre_b = params["pre_ln_b"][None, :]
    post_g = params["post_ln_g"][None, :]
    post_b = params["post_ln_b"][None, :]
    patch_w = params["patch_w"].astype(jnp.bfloat16)

    inputs = [
        patches_pad, patch_w, emb_bias,
        pre_g, pre_b,
        ln1_g, ln1_b, qkv_w, qkv_b, o_w, o_b,
        ln2_g, ln2_b, fc1_w, fc1_b, fc2_w, fc2_b,
        post_g, post_b,
    ]

    in_specs = [
        pl.BlockSpec((1, SEQ_PAD, PATCH_FEAT), lambda b: (b, 0, 0)),   # per-batch patches
    ] + [_bcast_spec(a.shape) for a in inputs[1:]]

    slab = pl.pallas_call(
        _clip_fwd_kernel,
        out_shape=jax.ShapeDtypeStruct((B, SEQ_PAD, HIDDEN), jnp.float32),
        grid=(B,),
        in_specs=in_specs,
        out_specs=pl.BlockSpec((1, SEQ_PAD, HIDDEN), lambda b: (b, 0, 0)),
        compiler_params=pltpu.CompilerParams(
            dimension_semantics=("parallel",)
        ),
    )(*inputs)

    # pooled = post_layernorm(last_hidden_state[:, 0, :])
    return slab[:, 0, :]


# ---------------- params ----------------
def init_params(key):
    def nrm(k, shape, std=0.02):
        return (std * jax.random.normal(k, shape)).astype(jnp.float32)

    keys = iter(jax.random.split(key, 8 + NUM_LAYERS * 8))
    params = {
        # conv weight (hidden, C, p, p) flattened to (C*p*p, hidden) for matmul
        "patch_w": nrm(next(keys), (CHANNELS * PATCH * PATCH, HIDDEN)),
        "class_emb": nrm(next(keys), (HIDDEN,)),
        "pos_emb": nrm(next(keys), (SEQ, HIDDEN)),
        "pre_ln_g": jnp.ones((HIDDEN,), jnp.float32),
        "pre_ln_b": jnp.zeros((HIDDEN,), jnp.float32),
        "post_ln_g": jnp.ones((HIDDEN,), jnp.float32),
        "post_ln_b": jnp.zeros((HIDDEN,), jnp.float32),
        "layers": [],
    }
    for _ in range(NUM_LAYERS):
        layer = {
            "ln1_g": jnp.ones((HIDDEN,), jnp.float32),
            "ln1_b": jnp.zeros((HIDDEN,), jnp.float32),
            "q_w": nrm(next(keys), (HIDDEN, HIDDEN)),
            "q_b": jnp.zeros((HIDDEN,), jnp.float32),
            "k_w": nrm(next(keys), (HIDDEN, HIDDEN)),
            "k_b": jnp.zeros((HIDDEN,), jnp.float32),
            "v_w": nrm(next(keys), (HIDDEN, HIDDEN)),
            "v_b": jnp.zeros((HIDDEN,), jnp.float32),
            "o_w": nrm(next(keys), (HIDDEN, HIDDEN)),
            "o_b": jnp.zeros((HIDDEN,), jnp.float32),
            "ln2_g": jnp.ones((HIDDEN,), jnp.float32),
            "ln2_b": jnp.zeros((HIDDEN,), jnp.float32),
            "fc1_w": nrm(next(keys), (HIDDEN, MLP_DIM)),
            "fc1_b": jnp.zeros((MLP_DIM,), jnp.float32),
            "fc2_w": nrm(next(keys), (MLP_DIM, HIDDEN)),
            "fc2_b": jnp.zeros((HIDDEN,), jnp.float32),
        }
        params["layers"].append(layer)
    return params


if __name__ == "__main__":
    key = jax.random.PRNGKey(0)
    k_params, k_img = jax.random.split(key)
    params = init_params(k_params)
    image = jax.random.normal(
        k_img, (BATCH, CHANNELS, IMG, IMG), dtype=jnp.float32
    )
    out = jax.jit(clip_forward)(params, image)
    out = jax.block_until_ready(out)
    assert out.shape == (BATCH, HIDDEN), out.shape
    assert bool(jnp.all(jnp.isfinite(out)))
    print("KERNEL_OK")
</pallas_src>

<mosaic_0001>
module attributes {stable_mosaic.version = 11 : i64} {
  func.func @_clip_fwd_kernel(%arg0: i32, %arg1: memref<1x8x768xbf16, #tpu.memory_space<vmem>>, %arg2: memref<768x32xbf16, #tpu.memory_space<vmem>>, %arg3: memref<8x32xf32, #tpu.memory_space<vmem>>, %arg4: memref<1x32xf32, #tpu.memory_space<vmem>>, %arg5: memref<1x32xf32, #tpu.memory_space<vmem>>, %arg6: memref<2x1x32xf32, #tpu.memory_space<vmem>>, %arg7: memref<2x1x32xf32, #tpu.memory_space<vmem>>, %arg8: memref<2x32x128xbf16, #tpu.memory_space<vmem>>, %arg9: memref<2x1x128xf32, #tpu.memory_space<vmem>>, %arg10: memref<2x32x32xbf16, #tpu.memory_space<vmem>>, %arg11: memref<2x1x32xf32, #tpu.memory_space<vmem>>, %arg12: memref<2x1x32xf32, #tpu.memory_space<vmem>>, %arg13: memref<2x1x32xf32, #tpu.memory_space<vmem>>, %arg14: memref<2x32x128xbf16, #tpu.memory_space<vmem>>, %arg15: memref<2x1x128xf32, #tpu.memory_space<vmem>>, %arg16: memref<2x128x32xbf16, #tpu.memory_space<vmem>>, %arg17: memref<2x1x32xf32, #tpu.memory_space<vmem>>, %arg18: memref<1x32xf32, #tpu.memory_space<vmem>>, %arg19: memref<1x32xf32, #tpu.memory_space<vmem>>, %arg20: memref<1x8x32xf32, #tpu.memory_space<vmem>>) attributes {dimension_semantics = [#tpu.dimension_semantics<parallel>], iteration_bounds = array<i64: 2>, scalar_prefetch = 0 : i64, scratch_operands = 0 : i64, tpu.core_type = #tpu.core_type<tc>, window_params = [{transform_indices = @transform_0, window_bounds = array<i64: 1, 8, 768>}, {pipeline_mode = #tpu.pipeline_mode<synchronous>, transform_indices = @transform_1, window_bounds = array<i64: 768, 32>}, {pipeline_mode = #tpu.pipeline_mode<synchronous>, transform_indices = @transform_2, window_bounds = array<i64: 8, 32>}, {pipeline_mode = #tpu.pipeline_mode<synchronous>, transform_indices = @transform_3, window_bounds = array<i64: 1, 32>}, {pipeline_mode = #tpu.pipeline_mode<synchronous>, transform_indices = @transform_4, window_bounds = array<i64: 1, 32>}, {pipeline_mode = #tpu.pipeline_mode<synchronous>, transform_indices = @transform_5, window_bounds = array<i64: 2, 1, 32>}, {pipeline_mode = #tpu.pipeline_mode<synchronous>, transform_indices = @transform_6, window_bounds = array<i64: 2, 1, 32>}, {pipeline_mode = #tpu.pipeline_mode<synchronous>, transform_indices = @transform_7, window_bounds = array<i64: 2, 32, 128>}, {pipeline_mode = #tpu.pipeline_mode<synchronous>, transform_indices = @transform_8, window_bounds = array<i64: 2, 1, 128>}, {pipeline_mode = #tpu.pipeline_mode<synchronous>, transform_indices = @transform_9, window_bounds = array<i64: 2, 32, 32>}, {pipeline_mode = #tpu.pipeline_mode<synchronous>, transform_indices = @transform_10, window_bounds = array<i64: 2, 1, 32>}, {pipeline_mode = #tpu.pipeline_mode<synchronous>, transform_indices = @transform_11, window_bounds = array<i64: 2, 1, 32>}, {pipeline_mode = #tpu.pipeline_mode<synchronous>, transform_indices = @transform_12, window_bounds = array<i64: 2, 1, 32>}, {pipeline_mode = #tpu.pipeline_mode<synchronous>, transform_indices = @transform_13, window_bounds = array<i64: 2, 32, 128>}, {pipeline_mode = #tpu.pipeline_mode<synchronous>, transform_indices = @transform_14, window_bounds = array<i64: 2, 1, 128>}, {pipeline_mode = #tpu.pipeline_mode<synchronous>, transform_indices = @transform_15, window_bounds = array<i64: 2, 128, 32>}, {pipeline_mode = #tpu.pipeline_mode<synchronous>, transform_indices = @transform_16, window_bounds = array<i64: 2, 1, 32>}, {pipeline_mode = #tpu.pipeline_mode<synchronous>, transform_indices = @transform_17, window_bounds = array<i64: 1, 32>}, {pipeline_mode = #tpu.pipeline_mode<synchronous>, transform_indices = @transform_18, window_bounds = array<i64: 1, 32>}, {transform_indices = @transform_19, window_bounds = array<i64: 1, 8, 32>}]} {
    %c0 = arith.constant 0 : index
    %c0_0 = arith.constant 0 : index
    %c0_1 = arith.constant 0 : index
    %0 = vector.load %arg1[%c0, %c0_0, %c0_1] : memref<1x8x768xbf16, #tpu.memory_space<vmem>>, vector<1x8x768xbf16>
    %1 = vector.shape_cast %0 : vector<1x8x768xbf16> to vector<8x768xbf16>
    %c0_2 = arith.constant 0 : index
    %c0_3 = arith.constant 0 : index
    %2 = vector.load %arg2[%c0_2, %c0_3] : memref<768x32xbf16, #tpu.memory_space<vmem>>, vector<768x32xbf16>
    %cst = arith.constant dense<0.000000e+00> : vector<8x32xf32>
    %3 = tpu.matmul %1, %2, %cst {dimension_numbers = #tpu.dot_dimension_numbers<[1], [0], [0], [1], [0, 0, 1, 1], [], []>} : vector<8x768xbf16>, vector<768x32xbf16>, vector<8x32xf32> -> vector<8x32xf32>
    %c0_4 = arith.constant 0 : index
    %c0_5 = arith.constant 0 : index
    %4 = vector.load %arg3[%c0_4, %c0_5] : memref<8x32xf32, #tpu.memory_space<vmem>>, vector<8x32xf32>
    %5 = arith.addf %3, %4 : vector<8x32xf32>
    %c0_6 = arith.constant 0 : index
    %c0_7 = arith.constant 0 : index
    %6 = vector.load %arg4[%c0_6, %c0_7] : memref<1x32xf32, #tpu.memory_space<vmem>>, vector<1x32xf32>
    %c0_8 = arith.constant 0 : index
    %c0_9 = arith.constant 0 : index
    %7 = vector.load %arg5[%c0_8, %c0_9] : memref<1x32xf32, #tpu.memory_space<vmem>>, vector<1x32xf32>
    %cst_10 = arith.constant dense<0.000000e+00> : vector<8xf32>
    %8 = vector.multi_reduction <add>, %5, %cst_10 [1] : vector<8x32xf32> to vector<8xf32>
    %9 = vector.shape_cast %8 : vector<8xf32> to vector<8x1xf32>
    %cst_11 = arith.constant 3.200000e+01 : f32
    %10 = vector.broadcast %cst_11 : f32 to vector<8x1xf32>
    %11 = arith.divf %9, %10 : vector<8x1xf32>
    %12 = vector.broadcast %11 : vector<8x1xf32> to vector<8x32xf32>
    %13 = arith.subf %5, %12 : vector<8x32xf32>
    %14 = arith.mulf %13, %13 : vector<8x32xf32>
    %cst_12 = arith.constant dense<0.000000e+00> : vector<8xf32>
    %15 = vector.multi_reduction <add>, %14, %cst_12 [1] : vector<8x32xf32> to vector<8xf32>
    %16 = vector.shape_cast %15 : vector<8xf32> to vector<8x1xf32>
    %cst_13 = arith.constant 3.200000e+01 : f32
    %17 = vector.broadcast %cst_13 : f32 to vector<8x1xf32>
    %18 = arith.divf %16, %17 : vector<8x1xf32>
    %19 = vector.broadcast %11 : vector<8x1xf32> to vector<8x32xf32>
    %20 = arith.subf %5, %19 : vector<8x32xf32>
    %cst_14 = arith.constant 9.99999974E-6 : f32
    %21 = vector.broadcast %cst_14 : f32 to vector<8x1xf32>
    %22 = arith.addf %18, %21 : vector<8x1xf32>
    %23 = math.rsqrt %22 : vector<8x1xf32>
    %24 = vector.broadcast %23 : vector<8x1xf32> to vector<8x32xf32>
    %25 = arith.mulf %20, %24 : vector<8x32xf32>
    %26 = vector.broadcast %6 : vector<1x32xf32> to vector<8x32xf32>
    %27 = arith.mulf %25, %26 : vector<8x32xf32>
    %28 = vector.broadcast %7 : vector<1x32xf32> to vector<8x32xf32>
    %29 = arith.addf %27, %28 : vector<8x32xf32>
    %30 = tpu.iota {dimensions = array<i32: 1>} : vector<8x8xi32>
    %c5_i32 = arith.constant 5 : i32
    %31 = vector.broadcast %c5_i32 : i32 to vector<8x8xi32>
    %32 = arith.cmpi slt, %30, %31 : vector<8x8xi32>
    %c0_15 = arith.constant 0 : index
    %c0_16 = arith.constant 0 : index
    %c0_17 = arith.constant 0 : index
    %33 = vector.load %arg6[%c0_15, %c0_16, %c0_17] : memref<2x1x32xf32, #tpu.memory_space<vmem>>, vector<1x1x32xf32>
    %34 = vector.shape_cast %33 : vector<1x1x32xf32> to vector<1x32xf32>
    %c0_18 = arith.constant 0 : index
    %c0_19 = arith.constant 0 : index
    %c0_20 = arith.constant 0 : index
    %35 = vector.load %arg7[%c0_18, %c0_19, %c0_20] : memref<2x1x32xf32, #tpu.memory_space<vmem>>, vector<1x1x32xf32>
    %36 = vector.shape_cast %35 : vector<1x1x32xf32> to vector<1x32xf32>
    %cst_21 = arith.constant dense<0.000000e+00> : vector<8xf32>
    %37 = vector.multi_reduction <add>, %29, %cst_21 [1] : vector<8x32xf32> to vector<8xf32>
    %38 = vector.shape_cast %37 : vector<8xf32> to vector<8x1xf32>
    %cst_22 = arith.constant 3.200000e+01 : f32
    %39 = vector.broadcast %cst_22 : f32 to vector<8x1xf32>
    %40 = arith.divf %38, %39 : vector<8x1xf32>
    %41 = vector.broadcast %40 : vector<8x1xf32> to vector<8x32xf32>
    %42 = arith.subf %29, %41 : vector<8x32xf32>
    %43 = arith.mulf %42, %42 : vector<8x32xf32>
    %cst_23 = arith.constant dense<0.000000e+00> : vector<8xf32>
    %44 = vector.multi_reduction <add>, %43, %cst_23 [1] : vector<8x32xf32> to vector<8xf32>
    %45 = vector.shape_cast %44 : vector<8xf32> to vector<8x1xf32>
    %cst_24 = arith.constant 3.200000e+01 : f32
    %46 = vector.broadcast %cst_24 : f32 to vector<8x1xf32>
    %47 = arith.divf %45, %46 : vector<8x1xf32>
    %48 = vector.broadcast %40 : vector<8x1xf32> to vector<8x32xf32>
    %49 = arith.subf %29, %48 : vector<8x32xf32>
    %cst_25 = arith.constant 9.99999974E-6 : f32
    %50 = vector.broadcast %cst_25 : f32 to vector<8x1xf32>
    %51 = arith.addf %47, %50 : vector<8x1xf32>
    %52 = math.rsqrt %51 : vector<8x1xf32>
    %53 = vector.broadcast %52 : vector<8x1xf32> to vector<8x32xf32>
    %54 = arith.mulf %49, %53 : vector<8x32xf32>
    %55 = vector.broadcast %34 : vector<1x32xf32> to vector<8x32xf32>
    %56 = arith.mulf %54, %55 : vector<8x32xf32>
    %57 = vector.broadcast %36 : vector<1x32xf32> to vector<8x32xf32>
    %58 = arith.addf %56, %57 : vector<8x32xf32>
    %59 = arith.truncf %58 : vector<8x32xf32> to vector<8x32xbf16>
    %c0_26 = arith.constant 0 : index
    %c0_27 = arith.constant 0 : index
    %c0_28 = arith.constant 0 : index
    %60 = vector.load %arg8[%c0_26, %c0_27, %c0_28] : memref<2x32x128xbf16, #tpu.memory_space<vmem>>, vector<1x32x128xbf16>
    %61 = vector.shape_cast %60 : vector<1x32x128xbf16> to vector<32x128xbf16>
    %cst_29 = arith.constant dense<0.000000e+00> : vector<8x128xf32>
    %62 = tpu.matmul %59, %61, %cst_29 {dimension_numbers = #tpu.dot_dimension_numbers<[1], [0], [0], [1], [0, 0, 1, 1], [], []>} : vector<8x32xbf16>, vector<32x128xbf16>, vector<8x128xf32> -> vector<8x128xf32>
    %c0_30 = arith.constant 0 : index
    %c0_31 = arith.constant 0 : index
    %c0_32 = arith.constant 0 : index
    %63 = vector.load %arg9[%c0_30, %c0_31, %c0_32] : memref<2x1x128xf32, #tpu.memory_space<vmem>>, vector<1x1x128xf32>
    %64 = vector.shape_cast %63 : vector<1x1x128xf32> to vector<1x128xf32>
    %65 = vector.broadcast %64 : vector<1x128xf32> to vector<8x128xf32>
    %66 = arith.addf %62, %65 : vector<8x128xf32>
    %67 = arith.truncf %66 : vector<8x128xf32> to vector<8x128xbf16>
    %68 = vector.extract_strided_slice %67 {offsets = [0, 0], sizes = [8, 16], strides = [1, 1]} : vector<8x128xbf16> to vector<8x16xbf16>
    %69 = vector.extract_strided_slice %67 {offsets = [0, 32], sizes = [8, 16], strides = [1, 1]} : vector<8x128xbf16> to vector<8x16xbf16>
    %70 = vector.extract_strided_slice %67 {offsets = [0, 64], sizes = [8, 16], strides = [1, 1]} : vector<8x128xbf16> to vector<8x16xbf16>
    %cst_33 = arith.constant dense<0.000000e+00> : vector<8x8xf32>
    %71 = tpu.matmul %68, %69, %cst_33 {dimension_numbers = #tpu.dot_dimension_numbers<[1], [1], [0], [0], [0, 0, 1, 0], [], []>} : vector<8x16xbf16>, vector<8x16xbf16>, vector<8x8xf32> -> vector<8x8xf32>
    %cst_34 = arith.constant 2.500000e-01 : f32
    %72 = vector.broadcast %cst_34 : f32 to vector<8x8xf32>
    %73 = arith.mulf %71, %72 : vector<8x8xf32>
    %cst_35 = arith.constant -1.000000e+30 : f32
    %74 = vector.broadcast %cst_35 : f32 to vector<8x8xf32>
    %75 = arith.select %32, %73, %74 : vector<8x8xi1>, vector<8x8xf32>
    %cst_36 = arith.constant dense<0xFF800000> : vector<8xf32>
    %76 = vector.multi_reduction <maximumf>, %75, %cst_36 [1] : vector<8x8xf32> to vector<8xf32>
    %77 = vector.shape_cast %76 : vector<8xf32> to vector<8x1xf32>
    %78 = vector.broadcast %77 : vector<8x1xf32> to vector<8x8xf32>
    %79 = arith.subf %75, %78 : vector<8x8xf32>
    %80 = math.exp %79 : vector<8x8xf32>
    %cst_37 = arith.constant dense<0.000000e+00> : vector<8xf32>
    %81 = vector.multi_reduction <add>, %80, %cst_37 [1] : vector<8x8xf32> to vector<8xf32>
    %82 = vector.shape_cast %81 : vector<8xf32> to vector<8x1xf32>
    %83 = tpu.reciprocal %82 {approx = true} : vector<8x1xf32> -> vector<8x1xf32>
    %84 = vector.broadcast %83 : vector<8x1xf32> to vector<8x8xf32>
    %85 = arith.mulf %80, %84 : vector<8x8xf32>
    %86 = arith.truncf %85 : vector<8x8xf32> to vector<8x8xbf16>
    %cst_38 = arith.constant dense<0.000000e+00> : vector<8x16xf32>
    %87 = tpu.matmul %86, %70, %cst_38 {dimension_numbers = #tpu.dot_dimension_numbers<[1], [0], [0], [1], [0, 0, 1, 1], [], []>} : vector<8x8xbf16>, vector<8x16xbf16>, vector<8x16xf32> -> vector<8x16xf32>
    %88 = vector.extract_strided_slice %67 {offsets = [0, 16], sizes = [8, 16], strides = [1, 1]} : vector<8x128xbf16> to vector<8x16xbf16>
    %89 = vector.extract_strided_slice %67 {offsets = [0, 48], sizes = [8, 16], strides = [1, 1]} : vector<8x128xbf16> to vector<8x16xbf16>
    %90 = vector.extract_strided_slice %67 {offsets = [0, 80], sizes = [8, 16], strides = [1, 1]} : vector<8x128xbf16> to vector<8x16xbf16>
    %cst_39 = arith.constant dense<0.000000e+00> : vector<8x8xf32>
    %91 = tpu.matmul %88, %89, %cst_39 {dimension_numbers = #tpu.dot_dimension_numbers<[1], [1], [0], [0], [0, 0, 1, 0], [], []>} : vector<8x16xbf16>, vector<8x16xbf16>, vector<8x8xf32> -> vector<8x8xf32>
    %cst_40 = arith.constant 2.500000e-01 : f32
    %92 = vector.broadcast %cst_40 : f32 to vector<8x8xf32>
    %93 = arith.mulf %91, %92 : vector<8x8xf32>
    %cst_41 = arith.constant -1.000000e+30 : f32
    %94 = vector.broadcast %cst_41 : f32 to vector<8x8xf32>
    %95 = arith.select %32, %93, %94 : vector<8x8xi1>, vector<8x8xf32>
    %cst_42 = arith.constant dense<0xFF800000> : vector<8xf32>
    %96 = vector.multi_reduction <maximumf>, %95, %cst_42 [1] : vector<8x8xf32> to vector<8xf32>
    %97 = vector.shape_cast %96 : vector<8xf32> to vector<8x1xf32>
    %98 = vector.broadcast %97 : vector<8x1xf32> to vector<8x8xf32>
    %99 = arith.subf %95, %98 : vector<8x8xf32>
    %100 = math.exp %99 : vector<8x8xf32>
    %cst_43 = arith.constant dense<0.000000e+00> : vector<8xf32>
    %101 = vector.multi_reduction <add>, %100, %cst_43 [1] : vector<8x8xf32> to vector<8xf32>
    %102 = vector.shape_cast %101 : vector<8xf32> to vector<8x1xf32>
    %103 = tpu.reciprocal %102 {approx = true} : vector<8x1xf32> -> vector<8x1xf32>
    %104 = vector.broadcast %103 : vector<8x1xf32> to vector<8x8xf32>
    %105 = arith.mulf %100, %104 : vector<8x8xf32>
    %106 = arith.truncf %105 : vector<8x8xf32> to vector<8x8xbf16>
    %cst_44 = arith.constant dense<0.000000e+00> : vector<8x16xf32>
    %107 = tpu.matmul %106, %90, %cst_44 {dimension_numbers = #tpu.dot_dimension_numbers<[1], [0], [0], [1], [0, 0, 1, 1], [], []>} : vector<8x8xbf16>, vector<8x16xbf16>, vector<8x16xf32> -> vector<8x16xf32>
    %108 = tpu.concatenate %87, %107 in 1 : vector<8x16xf32>, vector<8x16xf32> -> vector<8x32xf32>
    %109 = arith.truncf %108 : vector<8x32xf32> to vector<8x32xbf16>
    %c0_45 = arith.constant 0 : index
    %c0_46 = arith.constant 0 : index
    %c0_47 = arith.constant 0 : index
    %110 = vector.load %arg10[%c0_45, %c0_46, %c0_47] : memref<2x32x32xbf16, #tpu.memory_space<vmem>>, vector<1x32x32xbf16>
    %111 = vector.shape_cast %110 : vector<1x32x32xbf16> to vector<32x32xbf16>
    %cst_48 = arith.constant dense<0.000000e+00> : vector<8x32xf32>
    %112 = tpu.matmul %109, %111, %cst_48 {dimension_numbers = #tpu.dot_dimension_numbers<[1], [0], [0], [1], [0, 0, 1, 1], [], []>} : vector<8x32xbf16>, vector<32x32xbf16>, vector<8x32xf32> -> vector<8x32xf32>
    %c0_49 = arith.constant 0 : index
    %c0_50 = arith.constant 0 : index
    %c0_51 = arith.constant 0 : index
    %113 = vector.load %arg11[%c0_49, %c0_50, %c0_51] : memref<2x1x32xf32, #tpu.memory_space<vmem>>, vector<1x1x32xf32>
    %114 = vector.shape_cast %113 : vector<1x1x32xf32> to vector<1x32xf32>
    %115 = vector.broadcast %114 : vector<1x32xf32> to vector<8x32xf32>
    %116 = arith.addf %112, %115 : vector<8x32xf32>
    %117 = arith.addf %29, %116 : vector<8x32xf32>
    %c0_52 = arith.constant 0 : index
    %c0_53 = arith.constant 0 : index
    %c0_54 = arith.constant 0 : index
    %118 = vector.load %arg12[%c0_52, %c0_53, %c0_54] : memref<2x1x32xf32, #tpu.memory_space<vmem>>, vector<1x1x32xf32>
    %119 = vector.shape_cast %118 : vector<1x1x32xf32> to vector<1x32xf32>
    %c0_55 = arith.constant 0 : index
    %c0_56 = arith.constant 0 : index
    %c0_57 = arith.constant 0 : index
    %120 = vector.load %arg13[%c0_55, %c0_56, %c0_57] : memref<2x1x32xf32, #tpu.memory_space<vmem>>, vector<1x1x32xf32>
    %121 = vector.shape_cast %120 : vector<1x1x32xf32> to vector<1x32xf32>
    %cst_58 = arith.constant dense<0.000000e+00> : vector<8xf32>
    %122 = vector.multi_reduction <add>, %117, %cst_58 [1] : vector<8x32xf32> to vector<8xf32>
    %123 = vector.shape_cast %122 : vector<8xf32> to vector<8x1xf32>
    %cst_59 = arith.constant 3.200000e+01 : f32
    %124 = vector.broadcast %cst_59 : f32 to vector<8x1xf32>
    %125 = arith.divf %123, %124 : vector<8x1xf32>
    %126 = vector.broadcast %125 : vector<8x1xf32> to vector<8x32xf32>
    %127 = arith.subf %117, %126 : vector<8x32xf32>
    %128 = arith.mulf %127, %127 : vector<8x32xf32>
    %cst_60 = arith.constant dense<0.000000e+00> : vector<8xf32>
    %129 = vector.multi_reduction <add>, %128, %cst_60 [1] : vector<8x32xf32> to vector<8xf32>
    %130 = vector.shape_cast %129 : vector<8xf32> to vector<8x1xf32>
    %cst_61 = arith.constant 3.200000e+01 : f32
    %131 = vector.broadcast %cst_61 : f32 to vector<8x1xf32>
    %132 = arith.divf %130, %131 : vector<8x1xf32>
    %133 = vector.broadcast %125 : vector<8x1xf32> to vector<8x32xf32>
    %134 = arith.subf %117, %133 : vector<8x32xf32>
    %cst_62 = arith.constant 9.99999974E-6 : f32
    %135 = vector.broadcast %cst_62 : f32 to vector<8x1xf32>
    %136 = arith.addf %132, %135 : vector<8x1xf32>
    %137 = math.rsqrt %136 : vector<8x1xf32>
    %138 = vector.broadcast %137 : vector<8x1xf32> to vector<8x32xf32>
    %139 = arith.mulf %134, %138 : vector<8x32xf32>
    %140 = vector.broadcast %119 : vector<1x32xf32> to vector<8x32xf32>
    %141 = arith.mulf %139, %140 : vector<8x32xf32>
    %142 = vector.broadcast %121 : vector<1x32xf32> to vector<8x32xf32>
    %143 = arith.addf %141, %142 : vector<8x32xf32>
    %144 = arith.truncf %143 : vector<8x32xf32> to vector<8x32xbf16>
    %c0_63 = arith.constant 0 : index
    %c0_64 = arith.constant 0 : index
    %c0_65 = arith.constant 0 : index
    %145 = vector.load %arg14[%c0_63, %c0_64, %c0_65] : memref<2x32x128xbf16, #tpu.memory_space<vmem>>, vector<1x32x128xbf16>
    %146 = vector.shape_cast %145 : vector<1x32x128xbf16> to vector<32x128xbf16>
    %cst_66 = arith.constant dense<0.000000e+00> : vector<8x128xf32>
    %147 = tpu.matmul %144, %146, %cst_66 {dimension_numbers = #tpu.dot_dimension_numbers<[1], [0], [0], [1], [0, 0, 1, 1], [], []>} : vector<8x32xbf16>, vector<32x128xbf16>, vector<8x128xf32> -> vector<8x128xf32>
    %c0_67 = arith.constant 0 : index
    %c0_68 = arith.constant 0 : index
    %c0_69 = arith.constant 0 : index
    %148 = vector.load %arg15[%c0_67, %c0_68, %c0_69] : memref<2x1x128xf32, #tpu.memory_space<vmem>>, vector<1x1x128xf32>
    %149 = vector.shape_cast %148 : vector<1x1x128xf32> to vector<1x128xf32>
    %150 = vector.broadcast %149 : vector<1x128xf32> to vector<8x128xf32>
    %151 = arith.addf %147, %150 : vector<8x128xf32>
    %cst_70 = arith.constant 1.702000e+00 : f32
    %152 = vector.broadcast %cst_70 : f32 to vector<8x128xf32>
    %153 = arith.mulf %152, %151 : vector<8x128xf32>
    %154 = arith.negf %153 : vector<8x128xf32>
    %155 = math.exp %154 : vector<8x128xf32>
    %cst_71 = arith.constant 1.000000e+00 : f32
    %156 = vector.broadcast %cst_71 : f32 to vector<8x128xf32>
    %157 = arith.addf %156, %155 : vector<8x128xf32>
    %158 = arith.divf %156, %157 : vector<8x128xf32>
    %159 = arith.mulf %151, %158 : vector<8x128xf32>
    %160 = arith.truncf %159 : vector<8x128xf32> to vector<8x128xbf16>
    %c0_72 = arith.constant 0 : index
    %c0_73 = arith.constant 0 : index
    %c0_74 = arith.constant 0 : index
    %161 = vector.load %arg16[%c0_72, %c0_73, %c0_74] : memref<2x128x32xbf16, #tpu.memory_space<vmem>>, vector<1x128x32xbf16>
    %162 = vector.shape_cast %161 : vector<1x128x32xbf16> to vector<128x32xbf16>
    %cst_75 = arith.constant dense<0.000000e+00> : vector<8x32xf32>
    %163 = tpu.matmul %160, %162, %cst_75 {dimension_numbers = #tpu.dot_dimension_numbers<[1], [0], [0], [1], [0, 0, 1, 1], [], []>} : vector<8x128xbf16>, vector<128x32xbf16>, vector<8x32xf32> -> vector<8x32xf32>
    %c0_76 = arith.constant 0 : index
    %c0_77 = arith.constant 0 : index
    %c0_78 = arith.constant 0 : index
    %164 = vector.load %arg17[%c0_76, %c0_77, %c0_78] : memref<2x1x32xf32, #tpu.memory_space<vmem>>, vector<1x1x32xf32>
    %165 = vector.shape_cast %164 : vector<1x1x32xf32> to vector<1x32xf32>
    %166 = vector.broadcast %165 : vector<1x32xf32> to vector<8x32xf32>
    %167 = arith.addf %163, %166 : vector<8x32xf32>
    %168 = arith.addf %117, %167 : vector<8x32xf32>
    %c1 = arith.constant 1 : index
    %c0_79 = arith.constant 0 : index
    %c0_80 = arith.constant 0 : index
    %169 = vector.load %arg6[%c1, %c0_79, %c0_80] : memref<2x1x32xf32, #tpu.memory_space<vmem>>, vector<1x1x32xf32>
    %170 = vector.shape_cast %169 : vector<1x1x32xf32> to vector<1x32xf32>
    %c1_81 = arith.constant 1 : index
    %c0_82 = arith.constant 0 : index
    %c0_83 = arith.constant 0 : index
    %171 = vector.load %arg7[%c1_81, %c0_82, %c0_83] : memref<2x1x32xf32, #tpu.memory_space<vmem>>, vector<1x1x32xf32>
    %172 = vector.shape_cast %171 : vector<1x1x32xf32> to vector<1x32xf32>
    %cst_84 = arith.constant dense<0.000000e+00> : vector<8xf32>
    %173 = vector.multi_reduction <add>, %168, %cst_84 [1] : vector<8x32xf32> to vector<8xf32>
    %174 = vector.shape_cast %173 : vector<8xf32> to vector<8x1xf32>
    %cst_85 = arith.constant 3.200000e+01 : f32
    %175 = vector.broadcast %cst_85 : f32 to vector<8x1xf32>
    %176 = arith.divf %174, %175 : vector<8x1xf32>
    %177 = vector.broadcast %176 : vector<8x1xf32> to vector<8x32xf32>
    %178 = arith.subf %168, %177 : vector<8x32xf32>
    %179 = arith.mulf %178, %178 : vector<8x32xf32>
    %cst_86 = arith.constant dense<0.000000e+00> : vector<8xf32>
    %180 = vector.multi_reduction <add>, %179, %cst_86 [1] : vector<8x32xf32> to vector<8xf32>
    %181 = vector.shape_cast %180 : vector<8xf32> to vector<8x1xf32>
    %cst_87 = arith.constant 3.200000e+01 : f32
    %182 = vector.broadcast %cst_87 : f32 to vector<8x1xf32>
    %183 = arith.divf %181, %182 : vector<8x1xf32>
    %184 = vector.broadcast %176 : vector<8x1xf32> to vector<8x32xf32>
    %185 = arith.subf %168, %184 : vector<8x32xf32>
    %cst_88 = arith.constant 9.99999974E-6 : f32
    %186 = vector.broadcast %cst_88 : f32 to vector<8x1xf32>
    %187 = arith.addf %183, %186 : vector<8x1xf32>
    %188 = math.rsqrt %187 : vector<8x1xf32>
    %189 = vector.broadcast %188 : vector<8x1xf32> to vector<8x32xf32>
    %190 = arith.mulf %185, %189 : vector<8x32xf32>
    %191 = vector.broadcast %170 : vector<1x32xf32> to vector<8x32xf32>
    %192 = arith.mulf %190, %191 : vector<8x32xf32>
    %193 = vector.broadcast %172 : vector<1x32xf32> to vector<8x32xf32>
    %194 = arith.addf %192, %193 : vector<8x32xf32>
    %195 = arith.truncf %194 : vector<8x32xf32> to vector<8x32xbf16>
    %c1_89 = arith.constant 1 : index
    %c0_90 = arith.constant 0 : index
    %c0_91 = arith.constant 0 : index
    %196 = vector.load %arg8[%c1_89, %c0_90, %c0_91] : memref<2x32x128xbf16, #tpu.memory_space<vmem>>, vector<1x32x128xbf16>
    %197 = vector.shape_cast %196 : vector<1x32x128xbf16> to vector<32x128xbf16>
    %cst_92 = arith.constant dense<0.000000e+00> : vector<8x128xf32>
    %198 = tpu.matmul %195, %197, %cst_92 {dimension_numbers = #tpu.dot_dimension_numbers<[1], [0], [0], [1], [0, 0, 1, 1], [], []>} : vector<8x32xbf16>, vector<32x128xbf16>, vector<8x128xf32> -> vector<8x128xf32>
    %c1_93 = arith.constant 1 : index
    %c0_94 = arith.constant 0 : index
    %c0_95 = arith.constant 0 : index
    %199 = vector.load %arg9[%c1_93, %c0_94, %c0_95] : memref<2x1x128xf32, #tpu.memory_space<vmem>>, vector<1x1x128xf32>
    %200 = vector.shape_cast %199 : vector<1x1x128xf32> to vector<1x128xf32>
    %201 = vector.broadcast %200 : vector<1x128xf32> to vector<8x128xf32>
    %202 = arith.addf %198, %201 : vector<8x128xf32>
    %203 = arith.truncf %202 : vector<8x128xf32> to vector<8x128xbf16>
    %204 = vector.extract_strided_slice %203 {offsets = [0, 0], sizes = [8, 16], strides = [1, 1]} : vector<8x128xbf16> to vector<8x16xbf16>
    %205 = vector.extract_strided_slice %203 {offsets = [0, 32], sizes = [8, 16], strides = [1, 1]} : vector<8x128xbf16> to vector<8x16xbf16>
    %206 = vector.extract_strided_slice %203 {offsets = [0, 64], sizes = [8, 16], strides = [1, 1]} : vector<8x128xbf16> to vector<8x16xbf16>
    %cst_96 = arith.constant dense<0.000000e+00> : vector<8x8xf32>
    %207 = tpu.matmul %204, %205, %cst_96 {dimension_numbers = #tpu.dot_dimension_numbers<[1], [1], [0], [0], [0, 0, 1, 0], [], []>} : vector<8x16xbf16>, vector<8x16xbf16>, vector<8x8xf32> -> vector<8x8xf32>
    %cst_97 = arith.constant 2.500000e-01 : f32
    %208 = vector.broadcast %cst_97 : f32 to vector<8x8xf32>
    %209 = arith.mulf %207, %208 : vector<8x8xf32>
    %cst_98 = arith.constant -1.000000e+30 : f32
    %210 = vector.broadcast %cst_98 : f32 to vector<8x8xf32>
    %211 = arith.select %32, %209, %210 : vector<8x8xi1>, vector<8x8xf32>
    %cst_99 = arith.constant dense<0xFF800000> : vector<8xf32>
    %212 = vector.multi_reduction <maximumf>, %211, %cst_99 [1] : vector<8x8xf32> to vector<8xf32>
    %213 = vector.shape_cast %212 : vector<8xf32> to vector<8x1xf32>
    %214 = vector.broadcast %213 : vector<8x1xf32> to vector<8x8xf32>
    %215 = arith.subf %211, %214 : vector<8x8xf32>
    %216 = math.exp %215 : vector<8x8xf32>
    %cst_100 = arith.constant dense<0.000000e+00> : vector<8xf32>
    %217 = vector.multi_reduction <add>, %216, %cst_100 [1] : vector<8x8xf32> to vector<8xf32>
    %218 = vector.shape_cast %217 : vector<8xf32> to vector<8x1xf32>
    %219 = tpu.reciprocal %218 {approx = true} : vector<8x1xf32> -> vector<8x1xf32>
    %220 = vector.broadcast %219 : vector<8x1xf32> to vector<8x8xf32>
    %221 = arith.mulf %216, %220 : vector<8x8xf32>
    %222 = arith.truncf %221 : vector<8x8xf32> to vector<8x8xbf16>
    %cst_101 = arith.constant dense<0.000000e+00> : vector<8x16xf32>
    %223 = tpu.matmul %222, %206, %cst_101 {dimension_numbers = #tpu.dot_dimension_numbers<[1], [0], [0], [1], [0, 0, 1, 1], [], []>} : vector<8x8xbf16>, vector<8x16xbf16>, vector<8x16xf32> -> vector<8x16xf32>
    %224 = vector.extract_strided_slice %203 {offsets = [0, 16], sizes = [8, 16], strides = [1, 1]} : vector<8x128xbf16> to vector<8x16xbf16>
    %225 = vector.extract_strided_slice %203 {offsets = [0, 48], sizes = [8, 16], strides = [1, 1]} : vector<8x128xbf16> to vector<8x16xbf16>
    %226 = vector.extract_strided_slice %203 {offsets = [0, 80], sizes = [8, 16], strides = [1, 1]} : vector<8x128xbf16> to vector<8x16xbf16>
    %cst_102 = arith.constant dense<0.000000e+00> : vector<8x8xf32>
    %227 = tpu.matmul %224, %225, %cst_102 {dimension_numbers = #tpu.dot_dimension_numbers<[1], [1], [0], [0], [0, 0, 1, 0], [], []>} : vector<8x16xbf16>, vector<8x16xbf16>, vector<8x8xf32> -> vector<8x8xf32>
    %cst_103 = arith.constant 2.500000e-01 : f32
    %228 = vector.broadcast %cst_103 : f32 to vector<8x8xf32>
    %229 = arith.mulf %227, %228 : vector<8x8xf32>
    %cst_104 = arith.constant -1.000000e+30 : f32
    %230 = vector.broadcast %cst_104 : f32 to vector<8x8xf32>
    %231 = arith.select %32, %229, %230 : vector<8x8xi1>, vector<8x8xf32>
    %cst_105 = arith.constant dense<0xFF800000> : vector<8xf32>
    %232 = vector.multi_reduction <maximumf>, %231, %cst_105 [1] : vector<8x8xf32> to vector<8xf32>
    %233 = vector.shape_cast %232 : vector<8xf32> to vector<8x1xf32>
    %234 = vector.broadcast %233 : vector<8x1xf32> to vector<8x8xf32>
    %235 = arith.subf %231, %234 : vector<8x8xf32>
    %236 = math.exp %235 : vector<8x8xf32>
    %cst_106 = arith.constant dense<0.000000e+00> : vector<8xf32>
    %237 = vector.multi_reduction <add>, %236, %cst_106 [1] : vector<8x8xf32> to vector<8xf32>
    %238 = vector.shape_cast %237 : vector<8xf32> to vector<8x1xf32>
    %239 = tpu.reciprocal %238 {approx = true} : vector<8x1xf32> -> vector<8x1xf32>
    %240 = vector.broadcast %239 : vector<8x1xf32> to vector<8x8xf32>
    %241 = arith.mulf %236, %240 : vector<8x8xf32>
    %242 = arith.truncf %241 : vector<8x8xf32> to vector<8x8xbf16>
    %cst_107 = arith.constant dense<0.000000e+00> : vector<8x16xf32>
    %243 = tpu.matmul %242, %226, %cst_107 {dimension_numbers = #tpu.dot_dimension_numbers<[1], [0], [0], [1], [0, 0, 1, 1], [], []>} : vector<8x8xbf16>, vector<8x16xbf16>, vector<8x16xf32> -> vector<8x16xf32>
    %244 = tpu.concatenate %223, %243 in 1 : vector<8x16xf32>, vector<8x16xf32> -> vector<8x32xf32>
    %245 = arith.truncf %244 : vector<8x32xf32> to vector<8x32xbf16>
    %c1_108 = arith.constant 1 : index
    %c0_109 = arith.constant 0 : index
    %c0_110 = arith.constant 0 : index
    %246 = vector.load %arg10[%c1_108, %c0_109, %c0_110] : memref<2x32x32xbf16, #tpu.memory_space<vmem>>, vector<1x32x32xbf16>
    %247 = vector.shape_cast %246 : vector<1x32x32xbf16> to vector<32x32xbf16>
    %cst_111 = arith.constant dense<0.000000e+00> : vector<8x32xf32>
    %248 = tpu.matmul %245, %247, %cst_111 {dimension_numbers = #tpu.dot_dimension_numbers<[1], [0], [0], [1], [0, 0, 1, 1], [], []>} : vector<8x32xbf16>, vector<32x32xbf16>, vector<8x32xf32> -> vector<8x32xf32>
    %c1_112 = arith.constant 1 : index
    %c0_113 = arith.constant 0 : index
    %c0_114 = arith.constant 0 : index
    %249 = vector.load %arg11[%c1_112, %c0_113, %c0_114] : memref<2x1x32xf32, #tpu.memory_space<vmem>>, vector<1x1x32xf32>
    %250 = vector.shape_cast %249 : vector<1x1x32xf32> to vector<1x32xf32>
    %251 = vector.broadcast %250 : vector<1x32xf32> to vector<8x32xf32>
    %252 = arith.addf %248, %251 : vector<8x32xf32>
    %253 = arith.addf %168, %252 : vector<8x32xf32>
    %c1_115 = arith.constant 1 : index
    %c0_116 = arith.constant 0 : index
    %c0_117 = arith.constant 0 : index
    %254 = vector.load %arg12[%c1_115, %c0_116, %c0_117] : memref<2x1x32xf32, #tpu.memory_space<vmem>>, vector<1x1x32xf32>
    %255 = vector.shape_cast %254 : vector<1x1x32xf32> to vector<1x32xf32>
    %c1_118 = arith.constant 1 : index
    %c0_119 = arith.constant 0 : index
    %c0_120 = arith.constant 0 : index
    %256 = vector.load %arg13[%c1_118, %c0_119, %c0_120] : memref<2x1x32xf32, #tpu.memory_space<vmem>>, vector<1x1x32xf32>
    %257 = vector.shape_cast %256 : vector<1x1x32xf32> to vector<1x32xf32>
    %cst_121 = arith.constant dense<0.000000e+00> : vector<8xf32>
    %258 = vector.multi_reduction <add>, %253, %cst_121 [1] : vector<8x32xf32> to vector<8xf32>
    %259 = vector.shape_cast %258 : vector<8xf32> to vector<8x1xf32>
    %cst_122 = arith.constant 3.200000e+01 : f32
    %260 = vector.broadcast %cst_122 : f32 to vector<8x1xf32>
    %261 = arith.divf %259, %260 : vector<8x1xf32>
    %262 = vector.broadcast %261 : vector<8x1xf32> to vector<8x32xf32>
    %263 = arith.subf %253, %262 : vector<8x32xf32>
    %264 = arith.mulf %263, %263 : vector<8x32xf32>
    %cst_123 = arith.constant dense<0.000000e+00> : vector<8xf32>
    %265 = vector.multi_reduction <add>, %264, %cst_123 [1] : vector<8x32xf32> to vector<8xf32>
    %266 = vector.shape_cast %265 : vector<8xf32> to vector<8x1xf32>
    %cst_124 = arith.constant 3.200000e+01 : f32
    %267 = vector.broadcast %cst_124 : f32 to vector<8x1xf32>
    %268 = arith.divf %266, %267 : vector<8x1xf32>
    %269 = vector.broadcast %261 : vector<8x1xf32> to vector<8x32xf32>
    %270 = arith.subf %253, %269 : vector<8x32xf32>
    %cst_125 = arith.constant 9.99999974E-6 : f32
    %271 = vector.broadcast %cst_125 : f32 to vector<8x1xf32>
    %272 = arith.addf %268, %271 : vector<8x1xf32>
    %273 = math.rsqrt %272 : vector<8x1xf32>
    %274 = vector.broadcast %273 : vector<8x1xf32> to vector<8x32xf32>
    %275 = arith.mulf %270, %274 : vector<8x32xf32>
    %276 = vector.broadcast %255 : vector<1x32xf32> to vector<8x32xf32>
    %277 = arith.mulf %275, %276 : vector<8x32xf32>
    %278 = vector.broadcast %257 : vector<1x32xf32> to vector<8x32xf32>
    %279 = arith.addf %277, %278 : vector<8x32xf32>
    %280 = arith.truncf %279 : vector<8x32xf32> to vector<8x32xbf16>
    %c1_126 = arith.constant 1 : index
    %c0_127 = arith.constant 0 : index
    %c0_128 = arith.constant 0 : index
    %281 = vector.load %arg14[%c1_126, %c0_127, %c0_128] : memref<2x32x128xbf16, #tpu.memory_space<vmem>>, vector<1x32x128xbf16>
    %282 = vector.shape_cast %281 : vector<1x32x128xbf16> to vector<32x128xbf16>
    %cst_129 = arith.constant dense<0.000000e+00> : vector<8x128xf32>
    %283 = tpu.matmul %280, %282, %cst_129 {dimension_numbers = #tpu.dot_dimension_numbers<[1], [0], [0], [1], [0, 0, 1, 1], [], []>} : vector<8x32xbf16>, vector<32x128xbf16>, vector<8x128xf32> -> vector<8x128xf32>
    %c1_130 = arith.constant 1 : index
    %c0_131 = arith.constant 0 : index
    %c0_132 = arith.constant 0 : index
    %284 = vector.load %arg15[%c1_130, %c0_131, %c0_132] : memref<2x1x128xf32, #tpu.memory_space<vmem>>, vector<1x1x128xf32>
    %285 = vector.shape_cast %284 : vector<1x1x128xf32> to vector<1x128xf32>
    %286 = vector.broadcast %285 : vector<1x128xf32> to vector<8x128xf32>
    %287 = arith.addf %283, %286 : vector<8x128xf32>
    %cst_133 = arith.constant 1.702000e+00 : f32
    %288 = vector.broadcast %cst_133 : f32 to vector<8x128xf32>
    %289 = arith.mulf %288, %287 : vector<8x128xf32>
    %290 = arith.negf %289 : vector<8x128xf32>
    %291 = math.exp %290 : vector<8x128xf32>
    %cst_134 = arith.constant 1.000000e+00 : f32
    %292 = vector.broadcast %cst_134 : f32 to vector<8x128xf32>
    %293 = arith.addf %292, %291 : vector<8x128xf32>
    %294 = arith.divf %292, %293 : vector<8x128xf32>
    %295 = arith.mulf %287, %294 : vector<8x128xf32>
    %296 = arith.truncf %295 : vector<8x128xf32> to vector<8x128xbf16>
    %c1_135 = arith.constant 1 : index
    %c0_136 = arith.constant 0 : index
    %c0_137 = arith.constant 0 : index
    %297 = vector.load %arg16[%c1_135, %c0_136, %c0_137] : memref<2x128x32xbf16, #tpu.memory_space<vmem>>, vector<1x128x32xbf16>
    %298 = vector.shape_cast %297 : vector<1x128x32xbf16> to vector<128x32xbf16>
    %cst_138 = arith.constant dense<0.000000e+00> : vector<8x32xf32>
    %299 = tpu.matmul %296, %298, %cst_138 {dimension_numbers = #tpu.dot_dimension_numbers<[1], [0], [0], [1], [0, 0, 1, 1], [], []>} : vector<8x128xbf16>, vector<128x32xbf16>, vector<8x32xf32> -> vector<8x32xf32>
    %c1_139 = arith.constant 1 : index
    %c0_140 = arith.constant 0 : index
    %c0_141 = arith.constant 0 : index
    %300 = vector.load %arg17[%c1_139, %c0_140, %c0_141] : memref<2x1x32xf32, #tpu.memory_space<vmem>>, vector<1x1x32xf32>
    %301 = vector.shape_cast %300 : vector<1x1x32xf32> to vector<1x32xf32>
    %302 = vector.broadcast %301 : vector<1x32xf32> to vector<8x32xf32>
    %303 = arith.addf %299, %302 : vector<8x32xf32>
    %304 = arith.addf %253, %303 : vector<8x32xf32>
    %c0_142 = arith.constant 0 : index
    %c0_143 = arith.constant 0 : index
    %305 = vector.load %arg18[%c0_142, %c0_143] : memref<1x32xf32, #tpu.memory_space<vmem>>, vector<1x32xf32>
    %c0_144 = arith.constant 0 : index
    %c0_145 = arith.constant 0 : index
    %306 = vector.load %arg19[%c0_144, %c0_145] : memref<1x32xf32, #tpu.memory_space<vmem>>, vector<1x32xf32>
    %cst_146 = arith.constant dense<0.000000e+00> : vector<8xf32>
    %307 = vector.multi_reduction <add>, %304, %cst_146 [1] : vector<8x32xf32> to vector<8xf32>
    %308 = vector.shape_cast %307 : vector<8xf32> to vector<8x1xf32>
    %cst_147 = arith.constant 3.200000e+01 : f32
    %309 = vector.broadcast %cst_147 : f32 to vector<8x1xf32>
    %310 = arith.divf %308, %309 : vector<8x1xf32>
    %311 = vector.broadcast %310 : vector<8x1xf32> to vector<8x32xf32>
    %312 = arith.subf %304, %311 : vector<8x32xf32>
    %313 = arith.mulf %312, %312 : vector<8x32xf32>
    %cst_148 = arith.constant dense<0.000000e+00> : vector<8xf32>
    %314 = vector.multi_reduction <add>, %313, %cst_148 [1] : vector<8x32xf32> to vector<8xf32>
    %315 = vector.shape_cast %314 : vector<8xf32> to vector<8x1xf32>
    %cst_149 = arith.constant 3.200000e+01 : f32
    %316 = vector.broadcast %cst_149 : f32 to vector<8x1xf32>
    %317 = arith.divf %315, %316 : vector<8x1xf32>
    %318 = vector.broadcast %310 : vector<8x1xf32> to vector<8x32xf32>
    %319 = arith.subf %304, %318 : vector<8x32xf32>
    %cst_150 = arith.constant 9.99999974E-6 : f32
    %320 = vector.broadcast %cst_150 : f32 to vector<8x1xf32>
    %321 = arith.addf %317, %320 : vector<8x1xf32>
    %322 = math.rsqrt %321 : vector<8x1xf32>
    %323 = vector.broadcast %322 : vector<8x1xf32> to vector<8x32xf32>
    %324 = arith.mulf %319, %323 : vector<8x32xf32>
    %325 = vector.broadcast %305 : vector<1x32xf32> to vector<8x32xf32>
    %326 = arith.mulf %324, %325 : vector<8x32xf32>
    %327 = vector.broadcast %306 : vector<1x32xf32> to vector<8x32xf32>
    %328 = arith.addf %326, %327 : vector<8x32xf32>
    %c0_151 = arith.constant 0 : index
    %c0_152 = arith.constant 0 : index
    %c0_153 = arith.constant 0 : index
    %329 = vector.load %arg20[%c0_151, %c0_152, %c0_153] : memref<1x8x32xf32, #tpu.memory_space<vmem>>, vector<1x8x32xf32>
    %330 = vector.shape_cast %329 : vector<1x8x32xf32> to vector<8x32xf32>
    %331 = vector.shape_cast %328 : vector<8x32xf32> to vector<1x8x32xf32>
    tpu.vector_store %arg20[%c0_151, %c0_152, %c0_153], %331 {strides = array<i32>} : memref<1x8x32xf32, #tpu.memory_space<vmem>>, vector<1x8x32xf32>,
    return
  }
  func.func @transform_0(%arg0: i32) -> (i32, i32, i32) {
    %c0_i32 = arith.constant 0 : i32
    %c0_i32_0 = arith.constant 0 : i32
    %c0_i32_1 = arith.constant 0 : i32
    return %arg0, %c0_i32, %c0_i32_0 : i32, i32, i32
  }
  func.func @transform_1(%arg0: i32) -> (i32, i32) {
    %c0_i32 = arith.constant 0 : i32
    %c0_i32_0 = arith.constant 0 : i32
    %c0_i32_1 = arith.constant 0 : i32
    return %c0_i32, %c0_i32_0 : i32, i32
  }
  func.func @transform_2(%arg0: i32) -> (i32, i32) {
    %c0_i32 = arith.constant 0 : i32
    %c0_i32_0 = arith.constant 0 : i32
    %c0_i32_1 = arith.constant 0 : i32
    return %c0_i32, %c0_i32_0 : i32, i32
  }
  func.func @transform_3(%arg0: i32) -> (i32, i32) {
    %c0_i32 = arith.constant 0 : i32
    %c0_i32_0 = arith.constant 0 : i32
    %c0_i32_1 = arith.constant 0 : i32
    return %c0_i32, %c0_i32_0 : i32, i32
  }
  func.func @transform_4(%arg0: i32) -> (i32, i32) {
    %c0_i32 = arith.constant 0 : i32
    %c0_i32_0 = arith.constant 0 : i32
    %c0_i32_1 = arith.constant 0 : i32
    return %c0_i32, %c0_i32_0 : i32, i32
  }
  func.func @transform_5(%arg0: i32) -> (i32, i32, i32) {
    %c0_i32 = arith.constant 0 : i32
    %c0_i32_0 = arith.constant 0 : i32
    %c0_i32_1 = arith.constant 0 : i32
    %c0_i32_2 = arith.constant 0 : i32
    return %c0_i32, %c0_i32_0, %c0_i32_1 : i32, i32, i32
  }
  func.func @transform_6(%arg0: i32) -> (i32, i32, i32) {
    %c0_i32 = arith.constant 0 : i32
    %c0_i32_0 = arith.constant 0 : i32
    %c0_i32_1 = arith.constant 0 : i32
    %c0_i32_2 = arith.constant 0 : i32
    return %c0_i32, %c0_i32_0, %c0_i32_1 : i32, i32, i32
  }
  func.func @transform_7(%arg0: i32) -> (i32, i32, i32) {
    %c0_i32 = arith.constant 0 : i32
    %c0_i32_0 = arith.constant 0 : i32
    %c0_i32_1 = arith.constant 0 : i32
    %c0_i32_2 = arith.constant 0 : i32
    return %c0_i32, %c0_i32_0, %c0_i32_1 : i32, i32, i32
  }
  func.func @transform_8(%arg0: i32) -> (i32, i32, i32) {
    %c0_i32 = arith.constant 0 : i32
    %c0_i32_0 = arith.constant 0 : i32
    %c0_i32_1 = arith.constant 0 : i32
    %c0_i32_2 = arith.constant 0 : i32
    return %c0_i32, %c0_i32_0, %c0_i32_1 : i32, i32, i32
  }
  func.func @transform_9(%arg0: i32) -> (i32, i32, i32) {
    %c0_i32 = arith.constant 0 : i32
    %c0_i32_0 = arith.constant 0 : i32
    %c0_i32_1 = arith.constant 0 : i32
    %c0_i32_2 = arith.constant 0 : i32
    return %c0_i32, %c0_i32_0, %c0_i32_1 : i32, i32, i32
  }
  func.func @transform_10(%arg0: i32) -> (i32, i32, i32) {
    %c0_i32 = arith.constant 0 : i32
    %c0_i32_0 = arith.constant 0 : i32
    %c0_i32_1 = arith.constant 0 : i32
    %c0_i32_2 = arith.constant 0 : i32
    return %c0_i32, %c0_i32_0, %c0_i32_1 : i32, i32, i32
  }
  func.func @transform_11(%arg0: i32) -> (i32, i32, i32) {
    %c0_i32 = arith.constant 0 : i32
    %c0_i32_0 = arith.constant 0 : i32
    %c0_i32_1 = arith.constant 0 : i32
    %c0_i32_2 = arith.constant 0 : i32
    return %c0_i32, %c0_i32_0, %c0_i32_1 : i32, i32, i32
  }
  func.func @transform_12(%arg0: i32) -> (i32, i32, i32) {
    %c0_i32 = arith.constant 0 : i32
    %c0_i32_0 = arith.constant 0 : i32
    %c0_i32_1 = arith.constant 0 : i32
    %c0_i32_2 = arith.constant 0 : i32
    return %c0_i32, %c0_i32_0, %c0_i32_1 : i32, i32, i32
  }
  func.func @transform_13(%arg0: i32) -> (i32, i32, i32) {
    %c0_i32 = arith.constant 0 : i32
    %c0_i32_0 = arith.constant 0 : i32
    %c0_i32_1 = arith.constant 0 : i32
    %c0_i32_2 = arith.constant 0 : i32
    return %c0_i32, %c0_i32_0, %c0_i32_1 : i32, i32, i32
  }
  func.func @transform_14(%arg0: i32) -> (i32, i32, i32) {
    %c0_i32 = arith.constant 0 : i32
    %c0_i32_0 = arith.constant 0 : i32
    %c0_i32_1 = arith.constant 0 : i32
    %c0_i32_2 = arith.constant 0 : i32
    return %c0_i32, %c0_i32_0, %c0_i32_1 : i32, i32, i32
  }
  func.func @transform_15(%arg0: i32) -> (i32, i32, i32) {
    %c0_i32 = arith.constant 0 : i32
    %c0_i32_0 = arith.constant 0 : i32
    %c0_i32_1 = arith.constant 0 : i32
    %c0_i32_2 = arith.constant 0 : i32
    return %c0_i32, %c0_i32_0, %c0_i32_1 : i32, i32, i32
  }
  func.func @transform_16(%arg0: i32) -> (i32, i32, i32) {
    %c0_i32 = arith.constant 0 : i32
    %c0_i32_0 = arith.constant 0 : i32
    %c0_i32_1 = arith.constant 0 : i32
    %c0_i32_2 = arith.constant 0 : i32
    return %c0_i32, %c0_i32_0, %c0_i32_1 : i32, i32, i32
  }
  func.func @transform_17(%arg0: i32) -> (i32, i32) {
    %c0_i32 = arith.constant 0 : i32
    %c0_i32_0 = arith.constant 0 : i32
    %c0_i32_1 = arith.constant 0 : i32
    return %c0_i32, %c0_i32_0 : i32, i32
  }
  func.func @transform_18(%arg0: i32) -> (i32, i32) {
    %c0_i32 = arith.constant 0 : i32
    %c0_i32_0 = arith.constant 0 : i32
    %c0_i32_1 = arith.constant 0 : i32
    return %c0_i32, %c0_i32_0 : i32, i32
  }
  func.func @transform_19(%arg0: i32) -> (i32, i32, i32) {
    %c0_i32 = arith.constant 0 : i32
    %c0_i32_0 = arith.constant 0 : i32
    %c0_i32_1 = arith.constant 0 : i32
    return %arg0, %c0_i32, %c0_i32_0 : i32, i32, i32
  }
}

</mosaic_0001>

<bundles_post_ra>
// kernel: clip_forward.1
= control target key start
LH: loop header
LB: loop body
LE: loop exit
PB: predicated region body
PF: predicated region fallthrough
CT: control target
= control target key end

     0   :  { %s3636_s0 = inlined_call_operand.vmem [shape: bf16[2,8,768], index: 0, kind: input, shape index: {}]   ;;  %s3637_s1 = inlined_call_operand.vmem [shape: bf16[768,32], index: 1, kind: input, shape index: {}]   ;;  %s3638_s2 = inlined_call_operand.vmem [shape: f32[8,32], index: 2, kind: input, shape index: {}]   ;;  %s3639_s3 = inlined_call_operand.vmem [shape: f32[1,32], index: 3, kind: input, shape index: {}]   ;;  %s3640_s4 = inlined_call_operand.vmem [shape: f32[1,32], index: 4, kind: input, shape index: {}]   ;;  %s3641_s5 = inlined_call_operand.vmem [shape: f32[2,1,32], index: 5, kind: input, shape index: {}]   ;;  %s3642_s6 = inlined_call_operand.vmem [shape: f32[2,1,32], index: 6, kind: input, shape index: {}]   ;;  %s3643_s7 = inlined_call_operand.vmem [shape: bf16[2,32,128], index: 7, kind: input, shape index: {}]   ;;  %s3644_s8 = inlined_call_operand.vmem [shape: f32[2,1,128], index: 8, kind: input, shape index: {}]   ;;  %s3645_s9 = inlined_call_operand.vmem [shape: bf16[2,32,32], index: 9, kind: input, shape index: {}]   ;;  %s3646_s10 = inlined_call_operand.vmem [shape: f32[2,1,32], index: 10, kind: input, shape index: {}]   ;;  %s3647_s11 = inlined_call_operand.vmem [shape: f32[2,1,32], index: 11, kind: input, shape index: {}]   ;;  %s3648_s12 = inlined_call_operand.vmem [shape: f32[2,1,32], index: 12, kind: input, shape index: {}]   ;;  %s3649_s13 = inlined_call_operand.vmem [shape: bf16[2,32,128], index: 13, kind: input, shape index: {}]   ;;  %s3650_s14 = inlined_call_operand.vmem [shape: f32[2,1,128], index: 14, kind: input, shape index: {}]   ;;  %s3651_s15 = inlined_call_operand.vmem [shape: bf16[2,128,32], index: 15, kind: input, shape index: {}]   ;;  %s3652_s16 = inlined_call_operand.vmem [shape: f32[2,1,32], index: 16, kind: input, shape index: {}]   ;;  %s3653_s17 = inlined_call_operand.vmem [shape: f32[1,32], index: 17, kind: input, shape index: {}]   ;;  %s3654_s18 = inlined_call_operand.vmem [shape: f32[1,32], index: 18, kind: input, shape index: {}]   ;;  %s3655_s19 = inlined_call_operand.vmem [shape: f32[2,8,32], index: 19, kind: output, shape index: {}]  }
   0x1   :  { %3658 = sst [smem:[#allocation2_spill]] %s3636_s0  ;;  %s3151_s0 = smov 0  }
   0x2   :  { %3659 = sst [smem:[#allocation3_spill]] %s3637_s1 }
   0x3   :  { %3660 = sst [smem:[#allocation4_spill]] %s3638_s2 }
   0x4   :  { %3661 = sst [smem:[#allocation5_spill]] %s3639_s3 }
   0x5 LB: > { %s2483_s30 = sadd.s32 4294967295, %s3041_s0   ;;  %p2487_p0 = scmp.ge.s32.totalorder %s3041_s0, 1  ;;  %s3041_s0 = sphi %s3151_s0, %s29_s0  }
   0x6   : > { %p537_p1 = scmp.lt.s32.totalorder %s3041_s0, 3 }
   0x8   : > { %p538_p2 = pnand %p2487_p0, %p537_p1 }
   0x9   : > { %s3662_s1 = sld [smem:[#allocation3_spill]] (!%p538_p2)  ;;  %p592_p3 = scmp.lt.s32.totalorder (!%p538_p2), %s2483_s30, 1  ;;  %vm1133_vm0 = vcmask (!%p538_p2), 261120   ;;  %vm3044_vm1 = vmmov (!%p538_p2), 0   ;;  %vm1265_vm2 = vcmask (!%p538_p2), 130048   ;;  %vm1314_vm4 = vcmask (!%p538_p2), 64512  }
   0xa   : > { %541 = sbr.rel (%p538_p2) target bundleno = 7018 (0x1b6a), region = 96  ;;  %s3663_s21 = sld [smem:[#allocation2_spill]] (!%p538_p2)  ;;  %vm1332_vm5 = vcmask (!%p538_p2), 1043456  }
   0xb   : > { %s3664_s27 = sld [smem:[#allocation4_spill]] (!%p538_p2)  ;;  %s3665_s20 = sld [smem:[#allocation5_spill]] (!%p538_p2) }
   0xc   : > { %s3046_s23 = smov (!%p538_p2), 80   ;;  %s3047_s24 = smov (!%p538_p2), 64  }
   0xd   : > { %s3048_s25 = smov (!%p538_p2), 112   ;;  %s3657_s28 = smov (!%p538_p2), 16  }
   0xf   : > { %v2917_v0 = vld [vmem:[%s3662_s1 + $0x40] sm:$0xff] (!%p538_p2)   ;;  %v2921_v4 = vld [vmem:[%s3662_s1 + $0x48] sm:$0xff] (!%p538_p2)   ;;  %v2925_v8 = vld [vmem:[%s3662_s1 + $0x50] sm:$0xff] (!%p538_p2)  }
  0x10   : > { %v2918_v1 = vld [vmem:[%s3662_s1] sm:$0xff] (!%p538_p2)   ;;  %2646 = vmatprep.subr.bf16.mxu0 (!%p538_p2), %v2917_v0  ;;  %v2922_v5 = vld [vmem:[%s3662_s1 + $0x8] sm:$0xff] (!%p538_p2)   ;;  %v2926_v9 = vld [vmem:[%s3662_s1 + $0x10] sm:$0xff] (!%p538_p2)  }
  0x11   : > { %v2919_v2 = vld [vmem:[%s3662_s1 + $0xc0] sm:$0xff]   ;;  %2647 = vmatpush3.bf16.msra.mxu0 %v2918_v1  ;;  %v2923_v6 = vld [vmem:[%s3662_s1 + $0xc8] sm:$0xff]   ;;  %v2927_v10 = vld [vmem:[%s3662_s1 + $0xd0] sm:$0xff]   ;;  %s3668_s30 = smov (!%p592_p3, %s2483_s30), 1 }
  0x12   : > { %v2920_v3 = vld [vmem:[%s3662_s1 + $0x80] sm:$0xff]   ;;  %2668 = vmatprep.subr.bf16.mxu1 %v2919_v2  ;;  %2648 = vmatprep.subr.bf16.mxu0 %v2921_v4  ;;  %v2924_v7 = vld [vmem:[%s3662_s1 + $0x88] sm:$0xff]   ;;  %v2928_v11 = vld [vmem:[%s3662_s1 + $0x90] sm:$0xff]   ;;  %s2900_s22 = smul.u32 24, %s3668_s30 }
  0x13   : > { %2669 = vmatpush3.bf16.msra.mxu1 %v2920_v3  ;;  %v2929_v12 = vld [vmem:[%s3662_s1 + $0x58] sm:$0xff]   ;;  %v2933_v16 = vld [vmem:[%s3662_s1 + $0x60] sm:$0xff]   ;;  %v2937_v20 = vld [vmem:[%s3662_s1 + $0x68] sm:$0xff]  }
  0x14   : > { %2670 = vmatprep.subr.bf16.mxu1 %v2923_v6  ;;  %v2930_v13 = vld [vmem:[%s3662_s1 + $0x18] sm:$0xff]   ;;  %v2934_v17 = vld [vmem:[%s3662_s1 + $0x20] sm:$0xff]   ;;  %v2938_v21 = vld [vmem:[%s3662_s1 + $0x28] sm:$0xff]   ;;  %s3256_s2 = scalar_lea.vmem %s3663_s21, %s2900_s22  ;;  %s3045_s21 = smov 96  }
  0x15   : > { %2649 = vmatpush3.bf16.msra.mxu0 %v2922_v5  ;;  %v2931_v14 = vld [vmem:[%s3662_s1 + $0xd8] sm:$0xff]   ;;  %v2935_v18 = vld [vmem:[%s3662_s1 + $0xe0] sm:$0xff]   ;;  %v2939_v22 = vld [vmem:[%s3662_s1 + $0xe8] sm:$0xff]  }
  0x16   : > { %2650 = vmatprep.subr.bf16.mxu0 %v2925_v8  ;;  %v2932_v15 = vld [vmem:[%s3662_s1 + $0x98] sm:$0xff]   ;;  %v2936_v19 = vld [vmem:[%s3662_s1 + $0xa0] sm:$0xff]   ;;  %v2940_v23 = vld [vmem:[%s3662_s1 + $0xa8] sm:$0xff]  }
  0x17   : > { %2671 = vmatpush3.bf16.msra.mxu1 %v2924_v7  ;;  %v2941_v24 = vld [vmem:[%s3662_s1 + $0x70] sm:$0xff]   ;;  %v2945_v28 = vld [vmem:[%s3662_s1 + $0x78] sm:$0xff]   ;;  %v602_v31 = vld [vmem:[%s3256_s2] sm:$0xff] }
  0x18   : > { %2672 = vmatprep.subr.bf16.mxu1 %v2927_v10  ;;  %v2942_v25 = vld [vmem:[%s3662_s1 + $0x30] sm:$0xff]   ;;  %v2946_v29 = vld [vmem:[%s3662_s1 + $0x38] sm:$0xff]   ;;  %v2490_v32 = vcombine.low %v602_v31, %v602_v31  ;;  %v2491_v33 = vcombine.high %v602_v31, %v602_v31  ;;  %v2951_v35 = vld [vmem:[%s3662_s1 + $0x140] sm:$0xff]  }
  0x19   : > { %2651 = vmatpush3.bf16.msra.mxu0 %v2926_v9  ;;  %v2943_v26 = vld [vmem:[%s3662_s1 + $0xf0] sm:$0xff]   ;;  %v2947_v30 = vld [vmem:[%s3662_s1 + $0xf8] sm:$0xff]   ;;  %v603_v36 = vld [vmem:[%s3256_s2 + $0x8] sm:$0xff] }
  0x1a   : > { %2652 = vmatprep.subr.bf16.mxu0 %v2929_v12  ;;  %v2944_v27 = vld [vmem:[%s3662_s1 + $0xb0] sm:$0xff]   ;;  %v2950_v34 = vld [vmem:[%s3662_s1 + $0xb8] sm:$0xff]   ;;  %1043 = vmatprep.mubr.bf16.mxu0 %v2491_v33  ;;  %v2492_v37 = vcombine.low %v603_v36, %v603_v36  ;;  %v2493_v38 = vcombine.high %v603_v36, %v603_v36  ;;  %v2954_v39 = vld [vmem:[%s3662_s1 + $0x100] sm:$0xff]  }
  0x1b   : > { %2673 = vmatpush3.bf16.msra.mxu1 %v2928_v11  ;;  %v2955_v40 = vld [vmem:[%s3662_s1 + $0x148] sm:$0xff]   ;;  %v2957_v42 = vld [vmem:[%s3662_s1 + $0x150] sm:$0xff]   ;;  %v2959_v44 = vld [vmem:[%s3662_s1 + $0x158] sm:$0xff]  }
  0x1c   : > { %2674 = vmatprep.subr.bf16.mxu1 %v2931_v14  ;;  %1083 = vmatprep.mubr.bf16.mxu1 %v2493_v38  ;;  %v2956_v41 = vld [vmem:[%s3662_s1 + $0x108] sm:$0xff]   ;;  %v2958_v43 = vld [vmem:[%s3662_s1 + $0x110] sm:$0xff]   ;;  %v2960_v45 = vld [vmem:[%s3662_s1 + $0x118] sm:$0xff]  }
  0x1d   : > { %2653 = vmatpush3.bf16.msra.mxu0 %v2930_v13  ;;  %v2961_v46 = vld [vmem:[%s3662_s1 + $0x160] sm:$0xff]   ;;  %v2963_v48 = vld [vmem:[%s3662_s1 + $0x168] sm:$0xff]   ;;  %v604_v49 = vld [vmem:[%s3256_s2 + $0x10] sm:$0xff]  ;;  %s3049_s2 = smov 48  }
  0x1e   : > { %2654 = vmatprep.subr.bf16.mxu0 %v2933_v16  ;;  %v2962_v47 = vld [vmem:[%s3662_s1 + $0x120] sm:$0xff]   ;;  %v2495_v50 = vcombine.high %v604_v49, %v604_v49  ;;  %v2964_v51 = vld [vmem:[%s3662_s1 + $0x128] sm:$0xff]   ;;  %v2965_v52 = vld [vmem:[%s3662_s1 + $0x170] sm:$0xff]   ;;  %v2494_v56 = vcombine.low %v604_v49, %v604_v49 }
  0x1f   : > { %2675 = vmatpush3.bf16.msra.mxu1 %v2932_v15  ;;  %v2966_v53 = vld [vmem:[%s3662_s1 + $0x130] sm:$0xff]   ;;  %v2967_v54 = vld [vmem:[%s3662_s1 + $0x178] sm:$0xff]   ;;  %v701_v58 = vld [vmem:[%s3664_s27] sm:$0xff] }
  0x20   : > { %2676 = vmatprep.subr.bf16.mxu1 %v2935_v18  ;;  %v2968_v55 = vld [vmem:[%s3662_s1 + $0x138] sm:$0xff]   ;;  %v2971_v33 = vld [vmem:[%s3643_s7] sm:$0xff]  }
  0x21   : > { %2655 = vmatpush3.bf16.msra.mxu0 %v2934_v17 }
  0x22   : > { %2656 = vmatprep.subr.bf16.mxu0 %v2937_v20 }
  0x23   : > { %2677 = vmatpush3.bf16.msra.mxu1 %v2936_v19 }
  0x24   : > { %2678 = vmatprep.subr.bf16.mxu1 %v2939_v22  ;;  %v2544_v22 = vld [vmem:[%s3665_s20] ss:$0 sm:$0xff] }
  0x25   : > { %2657 = vmatpush3.bf16.msra.mxu0 %v2938_v21 }
  0x26   : > { %2658 = vmatprep.subr.bf16.mxu0 %v2941_v24  ;;  %v2545_v24 = vld [vmem:[%s3640_s4] ss:$0 sm:$0xff] }
  0x27   : > { %2679 = vmatpush3.bf16.msra.mxu1 %v2940_v23 }
  0x28   : > { %2680 = vmatprep.subr.bf16.mxu1 %v2943_v26 }
  0x29   : > { %2659 = vmatpush3.bf16.msra.mxu0 %v2942_v25 }
  0x2a   : > { %2660 = vmatprep.subr.bf16.mxu0 %v2945_v28 }
  0x2b   : > { %2681 = vmatpush3.bf16.msra.mxu1 %v2944_v27 }
  0x2c   : > { %2682 = vmatprep.subr.bf16.mxu1 %v2947_v30 }
  0x2d   : > { %2661 = vmatpush3.bf16.msra.mxu0 %v2946_v29 }
  0x2e   : > { %2690 = vmatprep.subr.bf16.mxu0 %v2951_v35  ;;  %v2972_v35 = vld [vmem:[%s3643_s7 + $0x8] sm:$0xff]  }
  0x2f   : > { %2683 = vmatpush3.bf16.msra.mxu1 %v2950_v34  ;;  %v3043_v34 = vmov 0.0  }
  0x30   : > { %1044 = vmatmul.mubr.bf16.vlgmr.msra.gmra.mrb[0].mxu0 %v2490_v32  ;;  %2764 = vmatprep.subr.bf16.mxu1 %v3043_v34 }
  0x31   : > { %2691 = vmatpush3.bf16.msra.mxu0 %v2954_v39  ;;  %1123 = vmatprep.mubr.bf16.mxu0 %v2495_v50 }
  0x32   : > { %1084 = vmatmul.mubr.bf16.vlgmr.msra.gmra.mrb[0].mxu1 %v2492_v37  ;;  %2692 = vmatprep.subr.bf16.mxu0 %v2955_v40  ;;  %v2546_v40 = vld [vmem:[%s3641_s5] ss:$0 sm:$0xff] }
  0x33   : > { %2765 = vmatpush3.bf16.msra.mxu1 %v2971_v33  ;;  %2768 = vmatprep.mubr.msk.bf16.mxu1 %vm3044_vm1, %v3043_v34 }
  0x34   : > { %2766 = vmatprep.subr.bf16.mxu1 %v3043_v34 }
  0x35   : > { %2693 = vmatpush3.bf16.msra.mxu0 %v2956_v41 }
  0x36   : > { %2694 = vmatprep.subr.bf16.mxu0 %v2957_v42  ;;  %v2547_v42 = vld [vmem:[%s3642_s6] ss:$0 sm:$0xff] }
  0x37   : > { %2767 = vmatpush3.bf16.msra.mxu1 %v2972_v35 }
  0x38   : > { %2772 = vmatprep.subr.bf16.mxu1 %v3043_v34 }
  0x39   : > { %2695 = vmatpush3.bf16.msra.mxu0 %v2958_v43 }
  0x3a   : > { %2696 = vmatprep.subr.bf16.mxu0 %v2959_v44 }
  0x3d   : > { %2697 = vmatpush3.bf16.msra.mxu0 %v2960_v45 }
  0x3e   : > { %2698 = vmatprep.subr.bf16.mxu0 %v2961_v46  ;;  %v2548_v46 = vld [vmem:[%s3644_s8] ss:$0 sm:$0xff] }
  0x41   : > { %2699 = vmatpush3.bf16.msra.mxu0 %v2962_v47 }
  0x42   : > { %2700 = vmatprep.subr.bf16.mxu0 %v2963_v48 }
  0x45   : > { %2701 = vmatpush3.bf16.msra.mxu0 %v2964_v51 }
  0x46   : > { %2702 = vmatprep.subr.bf16.mxu0 %v2965_v52 }
  0x49   : > { %2703 = vmatpush3.bf16.msra.mxu0 %v2966_v53 }
  0x4a   : > { %2704 = vmatprep.subr.bf16.mxu0 %v2967_v54 }
  0x4d   : > { %2705 = vmatpush3.bf16.msra.mxu0 %v2968_v55  ;;  %v1162_v55 = vlaneseq }
  0x4e   : > { %2832 = vmatprep.subr.bf16.mxu0 %v3043_v34 }
  0x50   : > { %1124 = vmatmul.mubr.bf16.vlgmr.msra.gmra.mrb[4].mxu0 %v2494_v56  ;;  %v3373_v56 = vand.u32 127, %v1162_v55 }
  0x51   : > { %2836 = vmatprep.mubr.msk.bf16.mxu0 %vm3044_vm1, %v3043_v34 }
  0x52   : > { %vm1164_vm3 = vcmp.lt.s32.totalorder %v3373_v56, 5 }
 0x103   : > { %v2662_v57 = vpop.f32.mrb[0].mxu0 }
 0x104   : > { %v2663_v59 = vpop.f32.mrb[1].mxu0 }
 0x105   : > { %v2664_v60 = vadd.f32 %v2663_v59, %v2662_v57  ;;  %v2665_v61 = vpop.f32.mrb[2].mxu0  ;;  %v2684_v62 = vpop.f32.mrb[0].mxu1 }
 0x106   : > { %v2666_v63 = vpop.f32.mrb[3].mxu0  ;;  %v2685_v0 = vpop.f32.mrb[1].mxu1 }
 0x107   : > { %v1046_v1 = vadd.f32 %v2664_v60, %v701_v58  ;;  %v2686_v2 = vadd.f32 %v2685_v0, %v2684_v62  ;;  %v2687_v3 = vpop.f32.mrb[2].mxu1 }
 0x108   : > { %v2688_v4 = vpop.f32.mrb[3].mxu1 }
 0x109   : > { %v1086_v5 = vadd.f32 %v2686_v2, %v1046_v1 }
 0x123   : > { %v2706_v6 = vpop.f32.mrb[4].mxu0 }
 0x124   : > { %v2707_v7 = vpop.f32.mrb[5].mxu0 }
 0x125   : > { %v2708_v8 = vadd.f32 %v2707_v7, %v2706_v6  ;;  %v2709_v9 = vpop.f32.mrb[6].mxu0 }
 0x126   : > { %v2710_v10 = vpop.f32.mrb[7].mxu0 }
 0x127   : > { %v1126_v11 = vadd.f32 %v2708_v8, %v1086_v5 }
 0x129   : > { %v1134_v12 = vsel %vm1133_vm0, %v1126_v11, 0.0 }
 0x12a   : > { %1135 = vadd.xlane.f32.xlu0 %v1134_v12 }
 0x1b7   : > { %v1136_v13 = vpop.xlane.xlu0 %1135 }
 0x1b8   : > { %v1138_v14 = vmul.f32 0.03125, %v1136_v13 }
 0x1ba   : > { %v1139_v15 = vsub.f32 %v1126_v11, %v1138_v14 }
 0x1bc   : > { %v1140_v16 = vmul.f32 %v1139_v15, %v1139_v15 }
 0x1be   : > { %v1141_v17 = vsel %vm1133_vm0, %v1140_v16, 0.0 }
 0x1bf   : > { %1142 = vadd.xlane.f32.xlu0 %v1141_v17 }
 0x24c   : > { %v1143_v18 = vpop.xlane.xlu0 %1142 }
 0x24d   : > { %v1144_v19 = vmul.f32 0.03125, %v1143_v18 }
 0x24f   : > { %v1145_v20 = vadd.f32 1e-05, %v1144_v19 }
 0x251   : > { %2999 = vrsqrt.f32 %v1145_v20 }
 0x25b   : > { %v3000_v21 = vpop.eup %2999 }
 0x25c   : > { %v1147_v23 = vmul.f32 %v3000_v21, %v1139_v15 }
 0x25e   : > { %v1154_v25 = vmul.f32 %v2544_v22, %v1147_v23 }
 0x260   : > { %v3329_v26 = vadd.f32 %v2545_v24, %v1154_v25 }
 0x262   : > { %v1167_v27 = vsel %vm1133_vm0, %v3329_v26, 0.0 }
 0x263   : > { %1168 = vadd.xlane.f32.xlu1 %v1167_v27 }
 0x2f0   : > { %v1169_v28 = vpop.xlane.xlu1 %1168 }
 0x2f1   : > { %v1170_v29 = vmul.f32 0.03125, %v1169_v28 }
 0x2f3   : > { %v1171_v30 = vsub.f32 %v3329_v26, %v1170_v29 }
 0x2f5   : > { %v1172_v31 = vmul.f32 %v1171_v30, %v1171_v30 }
 0x2f7   : > { %v1173_v32 = vsel %vm1133_vm0, %v1172_v31, 0.0 }
 0x2f8   : > { %1174 = vadd.xlane.f32.xlu1 %v1173_v32 }
 0x385   : > { %v1175_v36 = vpop.xlane.xlu1 %1174 }
 0x386   : > { %v1176_v37 = vmul.f32 0.03125, %v1175_v36 }
 0x388   : > { %v1177_v38 = vadd.f32 1e-05, %v1176_v37 }
 0x38a   : > { %3001 = vrsqrt.f32 %v1177_v38  ;;  %v2973_v38 = vld [vmem:[%s3645_s9] sm:$0xff]  }
 0x394   : > { %v3002_v39 = vpop.eup %3001 }
 0x395   : > { %v1179_v41 = vmul.f32 %v3002_v39, %v1171_v30  ;;  %v2974_v39 = vld [vmem:[%s3645_s9 + $0x8] sm:$0xff]  }
 0x397   : > { %v1186_v43 = vmul.f32 %v2546_v40, %v1179_v41 }
 0x399   : > { %v1193_v44 = vadd.f32 %v2547_v42, %v1186_v43 }
 0x39b   : > { %v1194_v45 = vpack.c.bf16 %v1193_v44, %v1193_v44 }
 0x39d   : > { %2769 = vmatmul.mubr.msk.bf16.vlgmr.msra.gmra.mrb[4].mxu1 %vm1133_vm0, %v1194_v45 }
 0x39e   : > { %2774 = vmatprep.mubr.msk.bf16.mxu1 %vm3044_vm1, %v3043_v34 }
 0x470   : > { %v1255_v47 = vpop.f32.mrb[4].mxu1 }
 0x471   : > { %v1256_v48 = vadd.f32 %v2548_v46, %v1255_v47  ;;  %v2770_v49 = vpop.f32.mrb[5].mxu1  ;;  %v2556_v47 = vld [vmem:[%s3646_s10] ss:$0 sm:$0xff] }
 0x472   : > { %v1258_v50 = vpop.f32.mrb[6].mxu1 }
 0x473   : > { %v3361_v51 = vpack.c.bf16 %v1256_v48, %v1256_v48  ;;  %v2771_v52 = vpop.f32.mrb[7].mxu1 }
 0x475   : > { %1263 = vrot.lane.b32.xlu0 %v3361_v51, %s3045_s21 }
 0x479   : > { %1378 = vrot.lane.b32.xlu0 %v3361_v51, %s3046_s23 }
 0x4e7   : > { %v1264_v53 = vpop.permute.xlu0 %1263 }
 0x4e8   : > { %v1270_v54 = vsel %vm1265_vm2, %v1264_v53, 0 }
 0x4e9   : > { %2773 = vmatpush3.bf16.xpose.msra.mxu1 %v1270_v54 }
 0x4ea   : > { %2778 = vmatprep.subr.bf16.mxu1 %v3043_v34 }
 0x4eb   : > { %v1379_v10 = vpop.permute.xlu0 %1378 }
 0x4ec   : > { %v1384_v12 = vsel %vm1265_vm2, %v1379_v10, 0  ;;  %v2979_v10 = vld [vmem:[%s3651_s15 + $0x10] sm:$0xff]  }
 0x4f0   : > { %2775 = vmatmul.mubr.msk.bf16.vlgmr.msra.gmra.mrb[8].mxu1 %vm1265_vm2, %v3361_v51 }
 0x4f1   : > { %2780 = vmatprep.mubr.msk.bf16.mxu1 %vm3044_vm1, %v3043_v34 }
 0x5c3   : > { %v1306_v57 = vpop.f32.mrb[8].mxu1 }
 0x5c4   : > { %v1312_v58 = vmul.f32 0.25, %v1306_v57  ;;  %v2776_v59 = vpop.f32.mrb[9].mxu1 }
 0x5c5   : > { %v1309_v60 = vpop.f32.mrb[10].mxu1 }
 0x5c6   : > { %v2777_v61 = vpop.f32.mrb[11].mxu1  ;;  %v1313_v62 = vsel %vm1164_vm3, %v1312_v58, -1e+30 }
 0x5c7   : > { %v1315_v63 = vsel %vm1314_vm4, %v1313_v62, -inf  ;;  %v2975_v61 = vld [vmem:[%s3649_s13] sm:$0xff]  }
 0x5c8   : > { %1316 = vmax.xlane.f32.xlu1 %v1315_v63 }
 0x655   : > { %v1317_v0 = vpop.xlane.xlu1 %1316 }
 0x656   : > { %v1318_v1 = vsub.f32 %v1313_v62, %v1317_v0 }
 0x658   : > { %v1319_v2 = vmul.f32 1.442695, %v1318_v1 }
 0x65a   : > { %3003 = vpow2.f32 %v1319_v2  ;;  %v2560_v2 = vld [vmem:[%s3647_s11] ss:$0 sm:$0xff] }
 0x664   : > { %v3004_v3 = vpop.eup %3003 }
 0x665   : > { %v1321_v4 = vsel %vm1314_vm4, %v3004_v3, 0.0 }
 0x666   : > { %1322 = vadd.xlane.f32.xlu1 %v1321_v4  ;;  %v2561_v4 = vld [vmem:[%s3648_s12] ss:$0 sm:$0xff] }
 0x677   : > { %1327 = vrot.lane.b32.xlu1 %v3361_v51, %s3047_s24 }
 0x67b   : > { %1376 = vrot.lane.b32.xlu1 %v3361_v51, %s3048_s25 }
 0x6f3   : > { %v1323_v5 = vpop.xlane.xlu1 %1322 }
 0x6f4   : > { %3005 = vrcp.f32 %v1323_v5 }
 0x6f7   : > { %v1328_v6 = vpop.permute.xlu1 %1327 }
 0x6f8   : > { %v1334_v7 = vsel %vm1332_vm5, %v1328_v6, 0 }
 0x6f9   : > { %2779 = vmatpush3.bf16.msra.mxu1 %v1334_v7 }
 0x6fa   : > { %2784 = vmatprep.subr.bf16.mxu1 %v3043_v34 }
 0x6fb   : > { %v1377_v13 = vpop.permute.xlu1 %1376 }
 0x6fe   : > { %v3006_v8 = vpop.eup %3005 }
 0x6ff   : > { %v1325_v9 = vmul.f32 %v3006_v8, %v3004_v3  ;;  %v2977_v8 = vld [vmem:[%s3651_s15] sm:$0xff]  }
 0x701   : > { %v1326_v11 = vpack.c.bf16 %v1325_v9, %v1325_v9  ;;  %v2978_v9 = vld [vmem:[%s3651_s15 + $0x8] sm:$0xff]  }
 0x703   : > { %2781 = vmatmul.mubr.msk.bf16.vlgmr.msra.gmra.mrb[12].mxu1 %vm1314_vm4, %v1326_v11  ;;  %v2980_v11 = vld [vmem:[%s3651_s15 + $0x18] sm:$0xff]  }
 0x704   : > { %2785 = vmatpush3.bf16.xpose.msra.mxu1 %v1384_v12  ;;  %2786 = vmatprep.mubr.msk.bf16.mxu1 %vm3044_vm1, %v3043_v34  ;;  %v2981_v12 = vld [vmem:[%s3651_s15 + $0x20] sm:$0xff]  }
 0x705   : > { %2790 = vmatprep.subr.bf16.mxu1 %v3043_v34 }
 0x70b   : > { %2787 = vmatmul.mubr.msk.bf16.vlgmr.msra.gmra.mrb[16].mxu1 %vm1265_vm2, %v1377_v13  ;;  %v2982_v13 = vld [vmem:[%s3651_s15 + $0x28] sm:$0xff]  }
 0x70c   : > { %2792 = vmatprep.mubr.msk.bf16.mxu1 %vm3044_vm1, %v3043_v34 }
 0x7d6   : > { %v1370_v14 = vpop.f32.mrb[12].mxu1 }
 0x7d7   : > { %v2782_v15 = vpop.f32.mrb[13].mxu1 }
 0x7d8   : > { %v1373_v16 = vpop.f32.mrb[14].mxu1  ;;  %v2984_v15 = vld [vmem:[%s3651_s15 + $0x38] sm:$0xff]  }
 0x7d9   : > { %v2783_v17 = vpop.f32.mrb[15].mxu1  ;;  %v2562_v16 = vld [vmem:[%s3650_s14] ss:$0 sm:$0xff] }
 0x7de   : > { %v1420_v18 = vpop.f32.mrb[16].mxu1 }
 0x7df   : > { %v1426_v19 = vmul.f32 0.25, %v1420_v18  ;;  %v2788_v20 = vpop.f32.mrb[17].mxu1 }
 0x7e0   : > { %v1423_v21 = vpop.f32.mrb[18].mxu1 }
 0x7e1   : > { %v2789_v22 = vpop.f32.mrb[19].mxu1  ;;  %v1427_v23 = vsel %vm1164_vm3, %v1426_v19, -1e+30 }
 0x7e2   : > { %v1428_v24 = vsel %vm1314_vm4, %v1427_v23, -inf }
 0x7e3   : > { %1429 = vmax.xlane.f32.xlu0 %v1428_v24 }
 0x7f9   : > { %1440 = vrot.lane.b32.xlu0 %v3361_v51, %s3049_s2 }
 0x870   : > { %v1430_v25 = vpop.xlane.xlu0 %1429 }
 0x871   : > { %v1431_v27 = vsub.f32 %v1427_v23, %v1430_v25 }
 0x873   : > { %v1432_v28 = vmul.f32 1.442695, %v1431_v27 }
 0x874   : > { %v1441_v29 = vpop.permute.xlu0 %1440 }
 0x875   : > { %3007 = vpow2.f32 %v1432_v28  ;;  %v1446_v30 = vsel %vm1332_vm5, %v1441_v29, 0 }
 0x876   : > { %2791 = vmatpush3.bf16.msra.mxu1 %v1446_v30  ;;  %v2567_v30 = vld [vmem:[%s3652_s16] ss:$0 sm:$0xff] }
 0x877   : > { %2796 = vmatprep.subr.bf16.mxu1 %v3043_v34 }
 0x87f   : > { %v3008_v31 = vpop.eup %3007 }
 0x880   : > { %v1434_v32 = vsel %vm1314_vm4, %v3008_v31, 0.0 }
 0x881   : > { %1435 = vadd.xlane.f32.xlu1 %v1434_v32 }
 0x90e   : > { %v1436_v33 = vpop.xlane.xlu1 %1435 }
 0x90f   : > { %3009 = vrcp.f32 %v1436_v33 }
 0x919   : > { %v3010_v35 = vpop.eup %3009 }
 0x91a   : > { %v1438_v36 = vmul.f32 %v3010_v35, %v3008_v31 }
 0x91c   : > { %v1439_v37 = vpack.c.bf16 %v1438_v36, %v1438_v36 }
 0x91e   : > { %2793 = vmatmul.mubr.msk.bf16.vlgmr.msra.gmra.mrb[20].mxu1 %vm1314_vm4, %v1439_v37 }
 0x91f   : > { %2800 = vmatprep.mubr.msk.bf16.mxu1 %vm3044_vm1, %v3043_v34  ;;  %2797 = vmatpush3.bf16.msra.mxu1 %v2973_v38 }
 0x920   : > { %2798 = vmatprep.subr.bf16.mxu1 %v3043_v34 }
 0x923   : > { %2799 = vmatpush3.bf16.msra.mxu1 %v2974_v39 }
 0x924   : > { %2804 = vmatprep.subr.bf16.mxu1 %v3043_v34 }
 0x9f1   : > { %v1482_v40 = vpop.f32.mrb[20].mxu1 }
 0x9f2   : > { %1489 = vrot.lane.b32.xlu1 %v1482_v40, %s3657_s28  ;;  %v2794_v41 = vpop.f32.mrb[21].mxu1 }
 0x9f3   : > { %v1485_v42 = vpop.f32.mrb[22].mxu1 }
 0x9f4   : > { %v2795_v43 = vpop.f32.mrb[23].mxu1 }
 0xa64   : > { %v1490_v44 = vpop.permute.xlu1 %1489 }
 0xa65   : > { %v1492_v45 = vsel %vm1265_vm2, %v1370_v14, %v1490_v44  ;;  %v2983_v14 = vld [vmem:[%s3651_s15 + $0x30] sm:$0xff]  }
 0xa66   : > { %v1493_v46 = vpack.c.bf16 %v1492_v45, %v1492_v45  ;;  %v2985_v44 = vld [vmem:[%s3643_s7 + $0x10] sm:$0xff]   ;;  %v2986_v45 = vld [vmem:[%s3643_s7 + $0x18] sm:$0xff]  }
 0xa67   : > { %2833 = vmatpush3.bf16.msra.mxu0 %v2985_v44 }
 0xa68   : > { %2801 = vmatmul.mubr.msk.bf16.vlgmr.msra.gmra.mrb[24].mxu1 %vm1133_vm0, %v1493_v46  ;;  %2834 = vmatprep.subr.bf16.mxu0 %v3043_v34 }
 0xa69   : > { %2808 = vmatprep.mubr.msk.bf16.mxu1 %vm3044_vm1, %v3043_v34  ;;  %2805 = vmatpush3.bf16.msra.mxu1 %v2975_v61 }
 0xa6a   : > { %2806 = vmatprep.subr.bf16.mxu1 %v3043_v34 }
 0xa6b   : > { %2835 = vmatpush3.bf16.msra.mxu0 %v2986_v45 }
 0xa6c   : > { %2840 = vmatprep.subr.bf16.mxu0 %v3043_v34 }
 0xb3b   : > { %v1554_v48 = vpop.f32.mrb[24].mxu1 }
 0xb3c   : > { %v1555_v49 = vadd.f32 %v2556_v47, %v1554_v48  ;;  %v2802_v50 = vpop.f32.mrb[25].mxu1 }
 0xb3d   : > { %v1557_v51 = vpop.f32.mrb[26].mxu1  ;;  %v2578_v50 = vld [vmem:[%s3641_s5 + $0x1] ss:$0 sm:$0xff] }
 0xb3e   : > { %v3422_v52 = vadd.f32 %v1555_v49, %v3329_v26  ;;  %v2803_v53 = vpop.f32.mrb[27].mxu1  ;;  %v2976_v26 = vld [vmem:[%s3649_s13 + $0x8] sm:$0xff]  }
 0xb3f   : > { %2807 = vmatpush3.bf16.msra.mxu1 %v2976_v26 }
 0xb40   : > { %v1563_v54 = vsel %vm1133_vm0, %v3422_v52, 0.0  ;;  %2812 = vmatprep.subr.bf16.mxu1 %v3043_v34 }
 0xb41   : > { %1564 = vadd.xlane.f32.xlu0 %v1563_v54 }
 0xbce   : > { %v1565_v55 = vpop.xlane.xlu0 %1564 }
 0xbcf   : > { %v1566_v57 = vmul.f32 0.03125, %v1565_v55 }
 0xbd1   : > { %v1567_v58 = vsub.f32 %v3422_v52, %v1566_v57  ;;  %v2585_v57 = vld [vmem:[%s3644_s8 + $0x1] ss:$0 sm:$0xff] }
 0xbd3   : > { %v1568_v59 = vmul.f32 %v1567_v58, %v1567_v58 }
 0xbd5   : > { %v1569_v60 = vsel %vm1133_vm0, %v1568_v59, 0.0 }
 0xbd6   : > { %1570 = vadd.xlane.f32.xlu1 %v1569_v60 }
 0xc63   : > { %v1571_v62 = vpop.xlane.xlu1 %1570 }
 0xc64   : > { %v1572_v63 = vmul.f32 0.03125, %v1571_v62 }
 0xc66   : > { %v1573_v0 = vadd.f32 1e-05, %v1572_v63 }
 0xc68   : > { %3011 = vrsqrt.f32 %v1573_v0 }
 0xc72   : > { %v3012_v1 = vpop.eup %3011 }
 0xc73   : > { %v1575_v3 = vmul.f32 %v3012_v1, %v1567_v58 }
 0xc75   : > { %v1582_v5 = vmul.f32 %v2560_v2, %v1575_v3 }
 0xc77   : > { %v1589_v6 = vadd.f32 %v2561_v4, %v1582_v5 }
 0xc79   : > { %v1590_v7 = vpack.c.bf16 %v1589_v6, %v1589_v6 }
 0xc7b   : > { %2809 = vmatmul.mubr.msk.bf16.vlgmr.msra.gmra.mrb[28].mxu1 %vm1133_vm0, %v1590_v7 }
 0xc7c   : > { %2828 = vmatprep.mubr.msk.bf16.mxu1 %vm3044_vm1, %v3043_v34  ;;  %2813 = vmatpush3.bf16.msra.mxu1 %v2977_v8 }
 0xc7d   : > { %2814 = vmatprep.subr.bf16.mxu1 %v3043_v34 }
 0xc80   : > { %2815 = vmatpush3.bf16.msra.mxu1 %v2978_v9 }
 0xc81   : > { %2816 = vmatprep.subr.bf16.mxu1 %v3043_v34 }
 0xc84   : > { %2817 = vmatpush3.bf16.msra.mxu1 %v2979_v10 }
 0xc85   : > { %2818 = vmatprep.subr.bf16.mxu1 %v3043_v34 }
 0xc88   : > { %2819 = vmatpush3.bf16.msra.mxu1 %v2980_v11 }
 0xc89   : > { %2820 = vmatprep.subr.bf16.mxu1 %v3043_v34 }
 0xc8c   : > { %2821 = vmatpush3.bf16.msra.mxu1 %v2981_v12 }
 0xc8d   : > { %2822 = vmatprep.subr.bf16.mxu1 %v3043_v34 }
 0xc90   : > { %2823 = vmatpush3.bf16.msra.mxu1 %v2982_v13 }
 0xc91   : > { %2824 = vmatprep.subr.bf16.mxu1 %v3043_v34 }
 0xc94   : > { %2825 = vmatpush3.bf16.msra.mxu1 %v2983_v14 }
 0xc95   : > { %2826 = vmatprep.subr.bf16.mxu1 %v3043_v34 }
 0xc98   : > { %2827 = vmatpush3.bf16.msra.mxu1 %v2984_v15 }
 0xc99   : > { %2858 = vmatprep.subr.bf16.mxu1 %v3043_v34 }
 0xd4e   : > { %v1651_v17 = vpop.f32.mrb[28].mxu1 }
 0xd4f   : > { %v1652_v18 = vadd.f32 %v2562_v16, %v1651_v17  ;;  %v2810_v19 = vpop.f32.mrb[29].mxu1 }
 0xd50   : > { %v1654_v20 = vpop.f32.mrb[30].mxu1 }
 0xd51   : > { %v2566_v21 = vmul.f32 -1.702, %v1652_v18  ;;  %v2811_v22 = vpop.f32.mrb[31].mxu1 }
 0xd53   : > { %v1659_v23 = vmul.f32 1.442695, %v2566_v21 }
 0xd55   : > { %3013 = vpow2.f32 %v1659_v23 }
 0xd5f   : > { %v3014_v24 = vpop.eup %3013 }
 0xd60   : > { %v1661_v25 = vadd.f32 1.0, %v3014_v24 }
 0xd62   : > { %3015 = vrcp.f32 %v1661_v25 }
 0xd6c   : > { %v3016_v27 = vpop.eup %3015 }
 0xd6d   : > { %v1664_v28 = vmul.f32 %v3016_v27, %v1652_v18 }
 0xd6f   : > { %v1665_v29 = vpack.c.bf16 %v1664_v28, %v1664_v28 }
 0xd71   : > { %2829 = vmatmul.mubr.bf16.vlgmr.msra.gmra.mrb[32].mxu1 %v1665_v29 }
 0xd72   : > { %2860 = vmatprep.mubr.msk.bf16.mxu1 %vm3044_vm1, %v3043_v34 }
 0xe44   : > { %v1771_v31 = vpop.f32.mrb[32].mxu1 }
 0xe45   : > { %v1772_v32 = vadd.f32 %v2567_v30, %v1771_v31  ;;  %v2830_v33 = vpop.f32.mrb[33].mxu1 }
 0xe46   : > { %v1774_v35 = vpop.f32.mrb[34].mxu1 }
 0xe47   : > { %v3486_v36 = vadd.f32 %v1772_v32, %v3422_v52  ;;  %v2831_v37 = vpop.f32.mrb[35].mxu1  ;;  %v2579_v52 = vld [vmem:[%s3642_s6 + $0x1] ss:$0 sm:$0xff] }
 0xe49   : > { %v1782_v38 = vsel %vm1133_vm0, %v3486_v36, 0.0 }
 0xe4a   : > { %1783 = vadd.xlane.f32.xlu0 %v1782_v38 }
 0xed7   : > { %v1784_v39 = vpop.xlane.xlu0 %1783 }
 0xed8   : > { %v1785_v40 = vmul.f32 0.03125, %v1784_v39 }
 0xeda   : > { %v1786_v41 = vsub.f32 %v3486_v36, %v1785_v40 }
 0xedc   : > { %v1787_v42 = vmul.f32 %v1786_v41, %v1786_v41 }
 0xede   : > { %v1788_v43 = vsel %vm1133_vm0, %v1787_v42, 0.0 }
 0xedf   : > { %1789 = vadd.xlane.f32.xlu0 %v1788_v43 }
 0xf6c   : > { %v1790_v46 = vpop.xlane.xlu0 %1789 }
 0xf6d   : > { %v1791_v47 = vmul.f32 0.03125, %v1790_v46  ;;  %v2987_v46 = vld [vmem:[%s3645_s9 + $0x10] sm:$0xff]  }
 0xf6f   : > { %v1792_v48 = vadd.f32 1e-05, %v1791_v47  ;;  %v2988_v47 = vld [vmem:[%s3645_s9 + $0x18] sm:$0xff]  }
 0xf71   : > { %3017 = vrsqrt.f32 %v1792_v48 }
 0xf7b   : > { %v3018_v49 = vpop.eup %3017 }
 0xf7c   : > { %v1794_v51 = vmul.f32 %v3018_v49, %v1786_v41 }
 0xf7e   : > { %v1801_v53 = vmul.f32 %v2578_v50, %v1794_v51 }
 0xf80   : > { %v1808_v54 = vadd.f32 %v2579_v52, %v1801_v53 }
 0xf82   : > { %v1809_v55 = vpack.c.bf16 %v1808_v54, %v1808_v54 }
 0xf84   : > { %2837 = vmatmul.mubr.msk.bf16.vlgmr.msra.gmra.mrb[8].mxu0 %vm1133_vm0, %v1809_v55  ;;  %v2598_v55 = vld [vmem:[%s3646_s10 + $0x1] ss:$0 sm:$0xff] }
 0xf85   : > { %2842 = vmatprep.mubr.msk.bf16.mxu0 %vm3044_vm1, %v3043_v34 }
0x1057   : > { %v1872_v58 = vpop.f32.mrb[8].mxu0 }
0x1058   : > { %v1873_v59 = vadd.f32 %v2585_v57, %v1872_v58  ;;  %v2838_v60 = vpop.f32.mrb[9].mxu0 }
0x1059   : > { %v1875_v61 = vpop.f32.mrb[10].mxu0 }
0x105a   : > { %v1878_v26 = vpack.c.bf16 %v1873_v59, %v1873_v59  ;;  %v2839_v62 = vpop.f32.mrb[11].mxu0 }
0x105c   : > { %1880 = vrot.lane.b32.xlu0 %v1878_v26, %s3045_s21 }
0x1060   : > { %1992 = vrot.lane.b32.xlu0 %v1878_v26, %s3046_s23  ;;  %s2489_s23 = sshll.u32 %s3668_s30, 3 }
0x1061   : > { %s600_s20 = scalar_lea.vmem %s3655_s19, %s2489_s23 }
0x10ce   : > { %v1881_v63 = vpop.permute.xlu0 %1880 }
0x10cf   : > { %v1886_v0 = vsel %vm1265_vm2, %v1881_v63, 0 }
0x10d0   : > { %2841 = vmatpush3.bf16.xpose.msra.mxu0 %v1886_v0 }
0x10d1   : > { %2846 = vmatprep.subr.bf16.mxu0 %v3043_v34 }
0x10d2   : > { %v1993_v18 = vpop.permute.xlu0 %1992 }
0x10d3   : > { %v1998_v20 = vsel %vm1265_vm2, %v1993_v18, 0  ;;  %v2994_v18 = vld [vmem:[%s3651_s15 + $0x58] sm:$0xff]  }
0x10d7   : > { %2843 = vmatmul.mubr.msk.bf16.vlgmr.msra.gmra.mrb[12].mxu0 %vm1265_vm2, %v1878_v26 }
0x10d8   : > { %2848 = vmatprep.mubr.msk.bf16.mxu0 %vm3044_vm1, %v3043_v34 }
0x11aa   : > { %v1922_v1 = vpop.f32.mrb[12].mxu0 }
0x11ab   : > { %v1928_v2 = vmul.f32 0.25, %v1922_v1  ;;  %v2844_v3 = vpop.f32.mrb[13].mxu0 }
0x11ac   : > { %v1925_v4 = vpop.f32.mrb[14].mxu0 }
0x11ad   : > { %v2845_v5 = vpop.f32.mrb[15].mxu0  ;;  %v1929_v6 = vsel %vm1164_vm3, %v1928_v2, -1e+30  ;;  %v2989_v4 = vld [vmem:[%s3649_s13 + $0x10] sm:$0xff]  }
0x11ae   : > { %v1930_v7 = vsel %vm1314_vm4, %v1929_v6, -inf }
0x11af   : > { %1931 = vmax.xlane.f32.xlu1 %v1930_v7 }
0x123c   : > { %v1932_v8 = vpop.xlane.xlu1 %1931 }
0x123d   : > { %v1933_v9 = vsub.f32 %v1929_v6, %v1932_v8 }
0x123f   : > { %v1934_v10 = vmul.f32 1.442695, %v1933_v9  ;;  %v2604_v9 = vld [vmem:[%s3647_s11 + $0x1] ss:$0 sm:$0xff] }
0x1241   : > { %3019 = vpow2.f32 %v1934_v10 }
0x124b   : > { %v3020_v11 = vpop.eup %3019 }
0x124c   : > { %v1936_v12 = vsel %vm1314_vm4, %v3020_v11, 0.0 }
0x124d   : > { %1937 = vadd.xlane.f32.xlu1 %v1936_v12 }
0x125e   : > { %1942 = vrot.lane.b32.xlu1 %v1878_v26, %s3047_s24 }
0x1262   : > { %1990 = vrot.lane.b32.xlu1 %v1878_v26, %s3048_s25 }
0x12da   : > { %v1938_v13 = vpop.xlane.xlu1 %1937 }
0x12db   : > { %3021 = vrcp.f32 %v1938_v13 }
0x12de   : > { %v1943_v14 = vpop.permute.xlu1 %1942 }
0x12df   : > { %v1948_v15 = vsel %vm1332_vm5, %v1943_v14, 0 }
0x12e0   : > { %2847 = vmatpush3.bf16.msra.mxu0 %v1948_v15  ;;  %v2991_v15 = vld [vmem:[%s3651_s15 + $0x40] sm:$0xff]  }
0x12e1   : > { %2852 = vmatprep.subr.bf16.mxu0 %v3043_v34 }
0x12e2   : > { %v1991_v21 = vpop.permute.xlu1 %1990 }
0x12e5   : > { %v3022_v16 = vpop.eup %3021 }
0x12e6   : > { %v1940_v17 = vmul.f32 %v3022_v16, %v3020_v11  ;;  %v2605_v11 = vld [vmem:[%s3648_s12 + $0x1] ss:$0 sm:$0xff]  ;;  %v2992_v16 = vld [vmem:[%s3651_s15 + $0x48] sm:$0xff]  }
0x12e8   : > { %v1941_v19 = vpack.c.bf16 %v1940_v17, %v1940_v17  ;;  %v2993_v17 = vld [vmem:[%s3651_s15 + $0x50] sm:$0xff]  }
0x12ea   : > { %2849 = vmatmul.mubr.msk.bf16.vlgmr.msra.gmra.mrb[16].mxu0 %vm1314_vm4, %v1941_v19  ;;  %v2995_v19 = vld [vmem:[%s3651_s15 + $0x60] sm:$0xff]  }
0x12eb   : > { %2853 = vmatpush3.bf16.xpose.msra.mxu0 %v1998_v20  ;;  %2854 = vmatprep.mubr.msk.bf16.mxu0 %vm3044_vm1, %v3043_v34  ;;  %v2996_v20 = vld [vmem:[%s3651_s15 + $0x68] sm:$0xff]  }
0x12ec   : > { %2864 = vmatprep.subr.bf16.mxu0 %v3043_v34 }
0x12f2   : > { %2855 = vmatmul.mubr.msk.bf16.vlgmr.msra.gmra.mrb[20].mxu0 %vm1265_vm2, %v1991_v21  ;;  %v2997_v21 = vld [vmem:[%s3651_s15 + $0x70] sm:$0xff]  }
0x12f3   : > { %2868 = vmatprep.mubr.msk.bf16.mxu0 %vm3044_vm1, %v3043_v34  ;;  %2865 = vmatpush3.bf16.msra.mxu0 %v2987_v46 }
0x12f4   : > { %2866 = vmatprep.subr.bf16.mxu0 %v3043_v34 }
0x12f7   : > { %2867 = vmatpush3.bf16.msra.mxu0 %v2988_v47 }
0x12f8   : > { %2880 = vmatprep.subr.bf16.mxu0 %v3043_v34 }
0x13bd   : > { %v1984_v22 = vpop.f32.mrb[16].mxu0 }
0x13be   : > { %v2850_v23 = vpop.f32.mrb[17].mxu0 }
0x13bf   : > { %v1987_v24 = vpop.f32.mrb[18].mxu0  ;;  %v2611_v23 = vld [vmem:[%s3650_s14 + $0x1] ss:$0 sm:$0xff] }
0x13c0   : > { %v2851_v25 = vpop.f32.mrb[19].mxu0 }
0x13c5   : > { %v2034_v27 = vpop.f32.mrb[20].mxu0 }
0x13c6   : > { %v2040_v28 = vmul.f32 0.25, %v2034_v27  ;;  %v2856_v29 = vpop.f32.mrb[21].mxu0 }
0x13c7   : > { %v2037_v30 = vpop.f32.mrb[22].mxu0 }
0x13c8   : > { %v2857_v31 = vpop.f32.mrb[23].mxu0  ;;  %v2041_v32 = vsel %vm1164_vm3, %v2040_v28, -1e+30 }
0x13c9   : > { %v2042_v33 = vsel %vm1314_vm4, %v2041_v32, -inf }
0x13ca   : > { %2043 = vmax.xlane.f32.xlu0 %v2042_v33 }
0x13e0   : > { %2054 = vrot.lane.b32.xlu0 %v1878_v26, %s3049_s2  ;;  %s3666_s2 = smov 16  }
0x1457   : > { %v2044_v35 = vpop.xlane.xlu0 %2043 }
0x1458   : > { %v2045_v37 = vsub.f32 %v2041_v32, %v2044_v35 }
0x145a   : > { %v2046_v38 = vmul.f32 1.442695, %v2045_v37 }
0x145b   : > { %v2055_v39 = vpop.permute.xlu0 %2054 }
0x145c   : > { %3023 = vpow2.f32 %v2046_v38  ;;  %v2060_v40 = vsel %vm1332_vm5, %v2055_v39, 0  ;;  %v2633_v38 = vld [vmem:[%s3652_s16 + $0x1] ss:$0 sm:$0xff] }
0x145d   : > { %2859 = vmatpush3.bf16.msra.mxu1 %v2060_v40 }
0x145e   : > { %2872 = vmatprep.subr.bf16.mxu1 %v3043_v34 }
0x1466   : > { %v3024_v41 = vpop.eup %3023 }
0x1467   : > { %v2048_v42 = vsel %vm1314_vm4, %v3024_v41, 0.0 }
0x1468   : > { %2049 = vadd.xlane.f32.xlu1 %v2048_v42 }
0x14f5   : > { %v2050_v56 = vpop.xlane.xlu1 %2049 }
0x14f6   : > { %3025 = vrcp.f32 %v2050_v56 }
0x1500   : > { %v3026_v43 = vpop.eup %3025 }
0x1501   : > { %v2052_v44 = vmul.f32 %v3026_v43, %v3024_v41 }
0x1503   : > { %v2053_v45 = vpack.c.bf16 %v2052_v44, %v2052_v44 }
0x1505   : > { %2861 = vmatmul.mubr.msk.bf16.vlgmr.msra.gmra.mrb[36].mxu1 %vm1314_vm4, %v2053_v45 }
0x1506   : > { %2876 = vmatprep.mubr.msk.bf16.mxu1 %vm3044_vm1, %v3043_v34  ;;  %2873 = vmatpush3.bf16.msra.mxu1 %v2989_v4 }
0x1507   : > { %2874 = vmatprep.subr.bf16.mxu1 %v3043_v34 }
0x15d8   : > { %v2096_v48 = vpop.f32.mrb[36].mxu1 }
0x15d9   : > { %2103 = vrot.lane.b32.xlu1 %v2096_v48, %s3666_s2  ;;  %v2862_v49 = vpop.f32.mrb[37].mxu1 }
0x15da   : > { %v2099_v50 = vpop.f32.mrb[38].mxu1 }
0x15db   : > { %v2863_v51 = vpop.f32.mrb[39].mxu1 }
0x164b   : > { %v2104_v52 = vpop.permute.xlu1 %2103 }
0x164c   : > { %v2106_v53 = vsel %vm1265_vm2, %v1984_v22, %v2104_v52  ;;  %v2998_v22 = vld [vmem:[%s3651_s15 + $0x78] sm:$0xff]  }
0x164d   : > { %v2107_v54 = vpack.c.bf16 %v2106_v53, %v2106_v53 }
0x164f   : > { %2869 = vmatmul.mubr.msk.bf16.vlgmr.msra.gmra.mrb[24].mxu0 %vm1133_vm0, %v2107_v54  ;;  %v2642_v54 = vld [vmem:[%s3653_s17] ss:$0 sm:$0xff] }
0x1650   : > { %2896 = vmatprep.mubr.msk.bf16.mxu0 %vm3044_vm1, %v3043_v34  ;;  %2881 = vmatpush3.bf16.msra.mxu0 %v2991_v15 }
0x1651   : > { %2882 = vmatprep.subr.bf16.mxu0 %v3043_v34 }
0x1654   : > { %2883 = vmatpush3.bf16.msra.mxu0 %v2992_v16 }
0x1655   : > { %2884 = vmatprep.subr.bf16.mxu0 %v3043_v34 }
0x1658   : > { %2885 = vmatpush3.bf16.msra.mxu0 %v2993_v17 }
0x1659   : > { %2886 = vmatprep.subr.bf16.mxu0 %v3043_v34 }
0x165c   : > { %2887 = vmatpush3.bf16.msra.mxu0 %v2994_v18 }
0x165d   : > { %2888 = vmatprep.subr.bf16.mxu0 %v3043_v34 }
0x1660   : > { %2889 = vmatpush3.bf16.msra.mxu0 %v2995_v19 }
0x1661   : > { %2890 = vmatprep.subr.bf16.mxu0 %v3043_v34 }
0x1664   : > { %2891 = vmatpush3.bf16.msra.mxu0 %v2996_v20 }
0x1665   : > { %2892 = vmatprep.subr.bf16.mxu0 %v3043_v34 }
0x1668   : > { %2893 = vmatpush3.bf16.msra.mxu0 %v2997_v21 }
0x1669   : > { %2894 = vmatprep.subr.bf16.mxu0 %v3043_v34 }
0x166c   : > { %2895 = vmatpush3.bf16.msra.mxu0 %v2998_v22 }
0x1722   : > { %v2170_v57 = vpop.f32.mrb[24].mxu0 }
0x1723   : > { %v2171_v58 = vadd.f32 %v2598_v55, %v2170_v57  ;;  %v2870_v59 = vpop.f32.mrb[25].mxu0  ;;  %v2643_v57 = vld [vmem:[%s3654_s18] ss:$0 sm:$0xff] }
0x1724   : > { %v2173_v60 = vpop.f32.mrb[26].mxu0 }
0x1725   : > { %v3562_v61 = vadd.f32 %v2171_v58, %v3486_v36  ;;  %v2871_v26 = vpop.f32.mrb[27].mxu0  ;;  %v2990_v36 = vld [vmem:[%s3649_s13 + $0x18] sm:$0xff]  }
0x1726   : > { %2875 = vmatpush3.bf16.msra.mxu1 %v2990_v36 }
0x1727   : > { %v2181_v62 = vsel %vm1133_vm0, %v3562_v61, 0.0 }
0x1728   : > { %2182 = vadd.xlane.f32.xlu0 %v2181_v62 }
0x17b5   : > { %v2183_v63 = vpop.xlane.xlu0 %2182 }
0x17b6   : > { %v2184_v0 = vmul.f32 0.03125, %v2183_v63 }
0x17b8   : > { %v2185_v1 = vsub.f32 %v3562_v61, %v2184_v0 }
0x17ba   : > { %v2186_v2 = vmul.f32 %v2185_v1, %v2185_v1 }
0x17bc   : > { %v2187_v3 = vsel %vm1133_vm0, %v2186_v2, 0.0 }
0x17bd   : > { %2188 = vadd.xlane.f32.xlu1 %v2187_v3 }
0x184a   : > { %v2189_v5 = vpop.xlane.xlu1 %2188 }
0x184b   : > { %v2190_v6 = vmul.f32 0.03125, %v2189_v5 }
0x184d   : > { %v2191_v7 = vadd.f32 1e-05, %v2190_v6 }
0x184f   : > { %3027 = vrsqrt.f32 %v2191_v7 }
0x1859   : > { %v3028_v8 = vpop.eup %3027 }
0x185a   : > { %v2193_v10 = vmul.f32 %v3028_v8, %v2185_v1 }
0x185c   : > { %v2200_v12 = vmul.f32 %v2604_v9, %v2193_v10 }
0x185e   : > { %v2207_v13 = vadd.f32 %v2605_v11, %v2200_v12 }
0x1860   : > { %v2208_v14 = vpack.c.bf16 %v2207_v13, %v2207_v13 }
0x1862   : > { %2877 = vmatmul.mubr.msk.bf16.vlgmr.msra.gmra.mrb[40].mxu1 %vm1133_vm0, %v2208_v14 }
0x1935   : > { %v2271_v24 = vpop.f32.mrb[40].mxu1 }
0x1936   : > { %v2272_v25 = vadd.f32 %v2611_v23, %v2271_v24  ;;  %v2878_v27 = vpop.f32.mrb[41].mxu1 }
0x1937   : > { %v2274_v28 = vpop.f32.mrb[42].mxu1 }
0x1938   : > { %v2615_v29 = vmul.f32 -1.702, %v2272_v25  ;;  %v2879_v30 = vpop.f32.mrb[43].mxu1 }
0x193a   : > { %v2279_v31 = vmul.f32 1.442695, %v2615_v29 }
0x193c   : > { %3029 = vpow2.f32 %v2279_v31 }
0x1946   : > { %v3030_v32 = vpop.eup %3029 }
0x1947   : > { %v2281_v33 = vadd.f32 1.0, %v3030_v32 }
0x1949   : > { %3031 = vrcp.f32 %v2281_v33 }
0x1953   : > { %v3032_v34 = vpop.eup %3031 }
0x1954   : > { %v2284_v35 = vmul.f32 %v3032_v34, %v2272_v25 }
0x1956   : > { %v2285_v37 = vpack.c.bf16 %v2284_v35, %v2284_v35 }
0x1958   : > { %2897 = vmatmul.mubr.bf16.vlgmr.msra.gmra.mrb[28].mxu0 %v2285_v37 }
0x1a2b   : > { %v2393_v39 = vpop.f32.mrb[28].mxu0 }
0x1a2c   : > { %v2394_v40 = vadd.f32 %v2633_v38, %v2393_v39  ;;  %v2898_v41 = vpop.f32.mrb[29].mxu0 }
0x1a2d   : > { %v2396_v42 = vpop.f32.mrb[30].mxu0 }
0x1a2e   : > { %v2899_v56 = vpop.f32.mrb[31].mxu0  ;;  %v2399_v43 = vadd.f32 %v2394_v40, %v3562_v61 }
0x1a30   : > { %v2402_v44 = vsel %vm1133_vm0, %v2399_v43, 0.0 }
0x1a31   : > { %2403 = vadd.xlane.f32.xlu0 %v2402_v44 }
0x1abe   : > { %v2404_v45 = vpop.xlane.xlu0 %2403 }
0x1abf   : > { %v2405_v46 = vmul.f32 0.03125, %v2404_v45 }
0x1ac1   : > { %v2406_v47 = vsub.f32 %v2399_v43, %v2405_v46 }
0x1ac3   : > { %v2407_v48 = vmul.f32 %v2406_v47, %v2406_v47 }
0x1ac5   : > { %v2408_v49 = vsel %vm1133_vm0, %v2407_v48, 0.0 }
0x1ac6   : > { %2409 = vadd.xlane.f32.xlu0 %v2408_v49 }
0x1b53   : > { %v2410_v50 = vpop.xlane.xlu0 %2409 }
0x1b54   : > { %v2411_v51 = vmul.f32 0.03125, %v2410_v50 }
0x1b56   : > { %v2412_v52 = vadd.f32 1e-05, %v2411_v51 }
0x1b58   : > { %3033 = vrsqrt.f32 %v2412_v52 }
0x1b62   : > { %v3034_v53 = vpop.eup %3033 }
0x1b63   : > { %v2414_v55 = vmul.f32 %v3034_v53, %v2406_v47 }
0x1b65   : > { %v2421_v58 = vmul.f32 %v2642_v54, %v2414_v55 }
0x1b67   : > { %v2428_v59 = vadd.f32 %v2643_v57, %v2421_v58 }
0x1b69   : > { %2429 = vst.msk [vmem:[%s600_s20] sm:$0xff] %vm1133_vm0, %v2428_v59 }
0x1b6a PF: > { %s29_s0 = sadd.s32 1, %s3041_s0  }
0x1b6b   : > { %p26_p4 = scmp.ge.s32.totalorder %s29_s0, 4  }
0x1b6d   :  { %28 = sbr.rel (!%p26_p4) target bundleno = 5 (0x5), region = 138 }

</bundles_post_ra>
